<compile_context>
chip_gen: v5e
topology: v5e:2x2
jax: 0.10.0
libtpu: 0.0.40
codegen_flags: <defaults>
</compile_context>

<pallas_src>
import functools
import math

import jax
import jax.numpy as jnp
from jax.experimental import pallas as pl
from jax.experimental.pallas import tpu as pltpu


# ----------------------------- config ---------------------------------------
HIDDEN = 32
NUM_HEADS = 4
HEAD_DIM = HIDDEN // NUM_HEADS
INTERMEDIATE = 64
NUM_LAYERS = 2
LAYER_NORM_EPS = 1e-12
BATCH = 2
SEQ = 8


def _layer_norm(x, gamma, beta, eps):
    # x: (R, H), gamma/beta: (1, H). Biased variance, like torch.nn.LayerNorm.
    mu = jnp.mean(x, axis=-1, keepdims=True)
    xc = x - mu
    var = jnp.mean(xc * xc, axis=-1, keepdims=True)
    inv = jax.lax.rsqrt(var + eps)
    return xc * inv * gamma + beta


def _gelu(x):
    # TODO(synk): torch.nn.GELU() default is exact erf GELU; using the tanh
    # approximation here (erf has no guaranteed Mosaic lowering).
    c = math.sqrt(2.0 / math.pi)
    return 0.5 * x * (1.0 + jnp.tanh(c * (x + 0.044715 * x * x * x)))


# ----------------------------- fused kernel ---------------------------------
def gutnet_encoder_kernel(
    x_ref,       # (B*S, H)        input activations
    mask_ref,    # (B*S, B*S)      additive cross-batch attention mask
    wqkv_ref,    # (L, H, 3H)      fused Q|K|V weights (Q pre-scaled)
    wo_ref,      # (L, H, H)       attention output dense
    wi_ref,      # (L, H, I)       intermediate dense
    w2_ref,      # (L, I, H)       output dense
    sp_ref,      # (L, 4, W)       packed small params (biases, LN gamma/beta)
    out_ref,     # (B*S, H)        final output
    *, num_layers, hidden, num_heads, head_dim, inter, eps,
):
    H, I = hidden, inter

    h_act = x_ref[...].astype(jnp.float32)            # running activation (value)
    mask = mask_ref[...]                               # (BS, BS), 0 / -1e30

    for layer in range(num_layers):                    # static unroll (L = 2)
        wqkv = wqkv_ref[layer]                         # (H, 3H)
        wo = wo_ref[layer]                             # (H, H)
        wi = wi_ref[layer]                             # (H, I)
        w2 = w2_ref[layer]                             # (I, H)
        sp = sp_ref[layer]                             # (4, W)

        # --- unpack small params (static lane/sublane slices of one slab) ----
        bqkv = sp[0:1, 0:3 * H]                        # (1, 3H)  (Q part pre-scaled)
        bo = sp[1:2, 0:H]
        g1 = sp[1:2, H:2 * H]
        be1 = sp[1:2, 2 * H:3 * H]
        bi = sp[2:3, 0:I]
        b2 = sp[2:3, I:I + H]
        g2 = sp[3:4, 0:H]
        be2 = sp[3:4, H:2 * H]

        x = h_act

        # --- self-attention: fused QKV projection -----------------------------
        qkv = jnp.dot(x, wqkv, preferred_element_type=jnp.float32) + bqkv
        q = qkv[:, 0:H]                                # already scaled by 1/sqrt(hd)
        k = qkv[:, H:2 * H]
        v = qkv[:, 2 * H:3 * H]

        # per-head attention across ALL batches at once; cross-batch links are
        # killed by the additive block-diagonal mask -> no data transposes.
        ctx_heads = []
        for hidx in range(num_heads):                  # static, 4 iterations
            c0 = hidx * head_dim
            qh = q[:, c0:c0 + head_dim]                # (BS, hd)
            kh = k[:, c0:c0 + head_dim]
            vh = v[:, c0:c0 + head_dim]
            # qh @ kh^T without an explicit transpose (contract RHS dim 1)
            scores = jax.lax.dot_general(
                qh, kh,
                dimension_numbers=(((1,), (1,)), ((), ())),
                preferred_element_type=jnp.float32) + mask
            scores = scores - jnp.max(scores, axis=-1, keepdims=True)
            e = jnp.exp(scores)
            probs = e / jnp.sum(e, axis=-1, keepdims=True)   # exact divide
            ctx_heads.append(
                jnp.dot(probs, vh, preferred_element_type=jnp.float32))
        ctx = jnp.concatenate(ctx_heads, axis=-1)      # (BS, H), lane concat

        # --- self-output: dense + residual + LayerNorm ------------------------
        attn = jnp.dot(ctx, wo, preferred_element_type=jnp.float32) + bo
        h1 = _layer_norm(attn + x, g1, be1, eps)

        # --- intermediate: dense + GELU ----------------------------------------
        inter_act = _gelu(
            jnp.dot(h1, wi, preferred_element_type=jnp.float32) + bi)

        # --- output: dense + residual + LayerNorm ------------------------------
        out = jnp.dot(inter_act, w2, preferred_element_type=jnp.float32) + b2
        h_act = _layer_norm(out + h1, g2, be2, eps)

    out_ref[...] = h_act.astype(out_ref.dtype)         # single store at the end


# ----------------------------- wrapper ---------------------------------------
def pack_params(layer_params, *, hidden, intermediate, head_dim):
    """One-time packing of per-layer params into stacked slabs (layer axis first).

    NOTE: the 1/sqrt(head_dim) attention scale is folded into the packed Q
    weights/bias, so the packed slabs are not interchangeable with the raw
    per-layer parameters.
    """
    H, I = hidden, intermediate
    W = max(3 * H, I + H)
    scale = 1.0 / math.sqrt(head_dim)

    def pad_row(row):
        return jnp.pad(row, ((0, 0), (0, W - row.shape[1])))

    wqkv, wo, wi, w2, sp = [], [], [], [], []
    for p in layer_params:
        wqkv.append(jnp.concatenate([p["wq"] * scale, p["wk"], p["wv"]], axis=1))
        wo.append(p["wo"])
        wi.append(p["wi"])
        w2.append(p["w2"])
        rows = [
            pad_row(jnp.concatenate([p["bq"] * scale, p["bk"], p["bv"]], axis=1)),
            pad_row(jnp.concatenate([p["bo"], p["g1"], p["be1"]], axis=1)),
            pad_row(jnp.concatenate([p["bi"], p["b2"]], axis=1)),
            pad_row(jnp.concatenate([p["g2"], p["be2"]], axis=1)),
        ]
        sp.append(jnp.concatenate(rows, axis=0))
    return {
        "wqkv": jnp.stack(wqkv),   # (L, H, 3H)
        "wo": jnp.stack(wo),       # (L, H, H)
        "wi": jnp.stack(wi),       # (L, H, I)
        "w2": jnp.stack(w2),       # (L, I, H)
        "sp": jnp.stack(sp),       # (L, 4, W)
    }


def gutnet_encoder(x, packed, *, num_heads, head_dim, eps):
    B, S, H = x.shape
    L = packed["wqkv"].shape[0]
    I = packed["wi"].shape[2]
    BS = B * S

    x2 = x.reshape(BS, H)

    # cross-batch additive attention mask: 0 within a batch block, -1e30 across.
    bids = jnp.repeat(jnp.arange(B), S)
    mask = jnp.where(bids[:, None] == bids[None, :], 0.0, -1e30).astype(jnp.float32)

    kernel = functools.partial(
        gutnet_encoder_kernel,
        num_layers=L, hidden=H, num_heads=num_heads,
        head_dim=head_dim, inter=I, eps=eps,
    )

    # No grid: everything is resident in VMEM for the whole (tiny) problem.
    vmem_spec = pl.BlockSpec(memory_space=pltpu.MemorySpace.VMEM)

    out = pl.pallas_call(
        kernel,
        out_shape=jax.ShapeDtypeStruct((BS, H), x.dtype),
        in_specs=[vmem_spec] * 7,
        out_specs=vmem_spec,
    )(x2, mask, packed["wqkv"], packed["wo"], packed["wi"], packed["w2"],
      packed["sp"])

    return out.reshape(B, S, H)


# ---------------------- pure-JAX reference (for verification) ---------------
def _ref_layer(x, p, *, num_heads, head_dim, eps):
    B, S, H = x.shape
    q = x @ p["wq"] + p["bq"][0]
    k = x @ p["wk"] + p["bk"][0]
    v = x @ p["wv"] + p["bv"][0]

    def split(t):  # (B,S,H) -> (B,nh,S,hd)
        return t.reshape(B, S, num_heads, head_dim).transpose(0, 2, 1, 3)

    qh, kh, vh = split(q), split(k), split(v)
    scores = jnp.einsum("bnqd,bnkd->bnqk", qh, kh) / math.sqrt(head_dim)
    probs = jax.nn.softmax(scores, axis=-1)
    ctx = jnp.einsum("bnqk,bnkd->bnqd", probs, vh)
    ctx = ctx.transpose(0, 2, 1, 3).reshape(B, S, H)
    attn = ctx @ p["wo"] + p["bo"][0]
    h1 = _layer_norm(attn + x, p["g1"], p["be1"], eps)
    inter = _gelu(h1 @ p["wi"] + p["bi"][0])
    out = inter @ p["w2"] + p["b2"][0]
    return _layer_norm(out + h1, p["g2"], p["be2"], eps)


def _ref_encoder(x, layer_params, **kw):
    for p in layer_params:
        x = _ref_layer(x, p, **kw)
    return x


# ----------------------------- param init -----------------------------------
def make_params(key, num_layers, hidden, intermediate):
    params = []
    for _ in range(num_layers):
        keys = jax.random.split(key, 7)
        key = keys[0]
        p = {
            "wq": 0.02 * jax.random.normal(keys[1], (hidden, hidden), jnp.float32),
            "bq": jnp.zeros((1, hidden), jnp.float32),
            "wk": 0.02 * jax.random.normal(keys[2], (hidden, hidden), jnp.float32),
            "bk": jnp.zeros((1, hidden), jnp.float32),
            "wv": 0.02 * jax.random.normal(keys[3], (hidden, hidden), jnp.float32),
            "bv": jnp.zeros((1, hidden), jnp.float32),
            "wo": 0.02 * jax.random.normal(keys[4], (hidden, hidden), jnp.float32),
            "bo": jnp.zeros((1, hidden), jnp.float32),
            "g1": jnp.ones((1, hidden), jnp.float32),
            "be1": jnp.zeros((1, hidden), jnp.float32),
            "wi": 0.02 * jax.random.normal(keys[5], (hidden, intermediate), jnp.float32),
            "bi": jnp.zeros((1, intermediate), jnp.float32),
            "w2": 0.02 * jax.random.normal(keys[6], (intermediate, hidden), jnp.float32),
            "b2": jnp.zeros((1, hidden), jnp.float32),
            "g2": jnp.ones((1, hidden), jnp.float32),
            "be2": jnp.zeros((1, hidden), jnp.float32),
        }
        params.append(p)
    return params


if __name__ == "__main__":
    root = jax.random.PRNGKey(0)
    k_x, k_p = jax.random.split(root)

    x = jax.random.normal(k_x, (BATCH, SEQ, HIDDEN), jnp.float32)
    layer_params = make_params(k_p, NUM_LAYERS, HIDDEN, INTERMEDIATE)
    packed = pack_params(layer_params, hidden=HIDDEN, intermediate=INTERMEDIATE,
                         head_dim=HEAD_DIM)

    out = gutnet_encoder(x, packed, num_heads=NUM_HEADS, head_dim=HEAD_DIM,
                         eps=LAYER_NORM_EPS)
    out = jax.block_until_ready(out)

    ref = _ref_encoder(x, layer_params, num_heads=NUM_HEADS, head_dim=HEAD_DIM,
                       eps=LAYER_NORM_EPS)
    assert out.shape == (BATCH, SEQ, HIDDEN)
    # exact softmax divide in the kernel -> tight f32 agreement
    assert jnp.allclose(out, ref, atol=1e-4, rtol=1e-4), "mismatch vs JAX reference"

    print("KERNEL_OK")
</pallas_src>

<mosaic_0001>
module attributes {stable_mosaic.version = 11 : i64} {
  func.func @gutnet_encoder_kernel(%arg0: memref<16x32xf32, #tpu.memory_space<vmem>>, %arg1: memref<16x16xf32, #tpu.memory_space<vmem>>, %arg2: memref<2x32x96xf32, #tpu.memory_space<vmem>>, %arg3: memref<2x32x32xf32, #tpu.memory_space<vmem>>, %arg4: memref<2x32x64xf32, #tpu.memory_space<vmem>>, %arg5: memref<2x64x32xf32, #tpu.memory_space<vmem>>, %arg6: memref<2x4x96xf32, #tpu.memory_space<vmem>>, %arg7: memref<16x32xf32, #tpu.memory_space<vmem>>) attributes {dimension_semantics = [], scalar_prefetch = 0 : i64, scratch_operands = 0 : i64, tpu.core_type = #tpu.core_type<tc>} {
    %c0 = arith.constant 0 : index
    %c0_0 = arith.constant 0 : index
    %0 = vector.load %arg0[%c0, %c0_0] : memref<16x32xf32, #tpu.memory_space<vmem>>, vector<16x32xf32>
    %c0_1 = arith.constant 0 : index
    %c0_2 = arith.constant 0 : index
    %1 = vector.load %arg1[%c0_1, %c0_2] : memref<16x16xf32, #tpu.memory_space<vmem>>, vector<16x16xf32>
    %c0_3 = arith.constant 0 : index
    %c0_4 = arith.constant 0 : index
    %c0_5 = arith.constant 0 : index
    %2 = vector.load %arg2[%c0_3, %c0_4, %c0_5] : memref<2x32x96xf32, #tpu.memory_space<vmem>>, vector<1x32x96xf32>
    %3 = vector.shape_cast %2 : vector<1x32x96xf32> to vector<32x96xf32>
    %c0_6 = arith.constant 0 : index
    %c0_7 = arith.constant 0 : index
    %c0_8 = arith.constant 0 : index
    %4 = vector.load %arg3[%c0_6, %c0_7, %c0_8] : memref<2x32x32xf32, #tpu.memory_space<vmem>>, vector<1x32x32xf32>
    %5 = vector.shape_cast %4 : vector<1x32x32xf32> to vector<32x32xf32>
    %c0_9 = arith.constant 0 : index
    %c0_10 = arith.constant 0 : index
    %c0_11 = arith.constant 0 : index
    %6 = vector.load %arg4[%c0_9, %c0_10, %c0_11] : memref<2x32x64xf32, #tpu.memory_space<vmem>>, vector<1x32x64xf32>
    %7 = vector.shape_cast %6 : vector<1x32x64xf32> to vector<32x64xf32>
    %c0_12 = arith.constant 0 : index
    %c0_13 = arith.constant 0 : index
    %c0_14 = arith.constant 0 : index
    %8 = vector.load %arg5[%c0_12, %c0_13, %c0_14] : memref<2x64x32xf32, #tpu.memory_space<vmem>>, vector<1x64x32xf32>
    %9 = vector.shape_cast %8 : vector<1x64x32xf32> to vector<64x32xf32>
    %c0_15 = arith.constant 0 : index
    %c0_16 = arith.constant 0 : index
    %c0_17 = arith.constant 0 : index
    %10 = vector.load %arg6[%c0_15, %c0_16, %c0_17] : memref<2x4x96xf32, #tpu.memory_space<vmem>>, vector<1x4x96xf32>
    %11 = vector.shape_cast %10 : vector<1x4x96xf32> to vector<4x96xf32>
    %12 = vector.extract_strided_slice %11 {offsets = [0, 0], sizes = [1, 96], strides = [1, 1]} : vector<4x96xf32> to vector<1x96xf32>
    %13 = vector.extract_strided_slice %11 {offsets = [1, 0], sizes = [1, 32], strides = [1, 1]} : vector<4x96xf32> to vector<1x32xf32>
    %14 = vector.extract_strided_slice %11 {offsets = [1, 32], sizes = [1, 32], strides = [1, 1]} : vector<4x96xf32> to vector<1x32xf32>
    %15 = vector.extract_strided_slice %11 {offsets = [1, 64], sizes = [1, 32], strides = [1, 1]} : vector<4x96xf32> to vector<1x32xf32>
    %16 = vector.extract_strided_slice %11 {offsets = [2, 0], sizes = [1, 64], strides = [1, 1]} : vector<4x96xf32> to vector<1x64xf32>
    %17 = vector.extract_strided_slice %11 {offsets = [2, 64], sizes = [1, 32], strides = [1, 1]} : vector<4x96xf32> to vector<1x32xf32>
    %18 = vector.extract_strided_slice %11 {offsets = [3, 0], sizes = [1, 32], strides = [1, 1]} : vector<4x96xf32> to vector<1x32xf32>
    %19 = vector.extract_strided_slice %11 {offsets = [3, 32], sizes = [1, 32], strides = [1, 1]} : vector<4x96xf32> to vector<1x32xf32>
    %cst = arith.constant dense<0.000000e+00> : vector<16x96xf32>
    %20 = tpu.matmul %0, %3, %cst {dimension_numbers = #tpu.dot_dimension_numbers<[1], [0], [0], [1], [0, 0, 1, 1], [], []>} : vector<16x32xf32>, vector<32x96xf32>, vector<16x96xf32> -> vector<16x96xf32>
    %21 = vector.broadcast %12 : vector<1x96xf32> to vector<16x96xf32>
    %22 = arith.addf %20, %21 : vector<16x96xf32>
    %23 = vector.extract_strided_slice %22 {offsets = [0, 0], sizes = [16, 32], strides = [1, 1]} : vector<16x96xf32> to vector<16x32xf32>
    %24 = vector.extract_strided_slice %22 {offsets = [0, 32], sizes = [16, 32], strides = [1, 1]} : vector<16x96xf32> to vector<16x32xf32>
    %25 = vector.extract_strided_slice %22 {offsets = [0, 64], sizes = [16, 32], strides = [1, 1]} : vector<16x96xf32> to vector<16x32xf32>
    %26 = vector.extract_strided_slice %23 {offsets = [0, 0], sizes = [16, 8], strides = [1, 1]} : vector<16x32xf32> to vector<16x8xf32>
    %27 = vector.extract_strided_slice %24 {offsets = [0, 0], sizes = [16, 8], strides = [1, 1]} : vector<16x32xf32> to vector<16x8xf32>
    %28 = vector.extract_strided_slice %25 {offsets = [0, 0], sizes = [16, 8], strides = [1, 1]} : vector<16x32xf32> to vector<16x8xf32>
    %cst_18 = arith.constant dense<0.000000e+00> : vector<16x16xf32>
    %29 = tpu.matmul %26, %27, %cst_18 {dimension_numbers = #tpu.dot_dimension_numbers<[1], [1], [0], [0], [0, 0, 1, 0], [], []>} : vector<16x8xf32>, vector<16x8xf32>, vector<16x16xf32> -> vector<16x16xf32>
    %30 = arith.addf %29, %1 : vector<16x16xf32>
    %cst_19 = arith.constant dense<0xFF800000> : vector<16xf32>
    %31 = vector.multi_reduction <maximumf>, %30, %cst_19 [1] : vector<16x16xf32> to vector<16xf32>
    %32 = vector.shape_cast %31 : vector<16xf32> to vector<16x1xf32>
    %33 = vector.broadcast %32 : vector<16x1xf32> to vector<16x16xf32>
    %34 = arith.subf %30, %33 : vector<16x16xf32>
    %35 = math.exp %34 : vector<16x16xf32>
    %cst_20 = arith.constant dense<0.000000e+00> : vector<16xf32>
    %36 = vector.multi_reduction <add>, %35, %cst_20 [1] : vector<16x16xf32> to vector<16xf32>
    %37 = vector.shape_cast %36 : vector<16xf32> to vector<16x1xf32>
    %38 = vector.broadcast %37 : vector<16x1xf32> to vector<16x16xf32>
    %39 = arith.divf %35, %38 : vector<16x16xf32>
    %cst_21 = arith.constant dense<0.000000e+00> : vector<16x8xf32>
    %40 = tpu.matmul %39, %28, %cst_21 {dimension_numbers = #tpu.dot_dimension_numbers<[1], [0], [0], [1], [0, 0, 1, 1], [], []>} : vector<16x16xf32>, vector<16x8xf32>, vector<16x8xf32> -> vector<16x8xf32>
    %41 = vector.extract_strided_slice %23 {offsets = [0, 8], sizes = [16, 8], strides = [1, 1]} : vector<16x32xf32> to vector<16x8xf32>
    %42 = vector.extract_strided_slice %24 {offsets = [0, 8], sizes = [16, 8], strides = [1, 1]} : vector<16x32xf32> to vector<16x8xf32>
    %43 = vector.extract_strided_slice %25 {offsets = [0, 8], sizes = [16, 8], strides = [1, 1]} : vector<16x32xf32> to vector<16x8xf32>
    %cst_22 = arith.constant dense<0.000000e+00> : vector<16x16xf32>
    %44 = tpu.matmul %41, %42, %cst_22 {dimension_numbers = #tpu.dot_dimension_numbers<[1], [1], [0], [0], [0, 0, 1, 0], [], []>} : vector<16x8xf32>, vector<16x8xf32>, vector<16x16xf32> -> vector<16x16xf32>
    %45 = arith.addf %44, %1 : vector<16x16xf32>
    %cst_23 = arith.constant dense<0xFF800000> : vector<16xf32>
    %46 = vector.multi_reduction <maximumf>, %45, %cst_23 [1] : vector<16x16xf32> to vector<16xf32>
    %47 = vector.shape_cast %46 : vector<16xf32> to vector<16x1xf32>
    %48 = vector.broadcast %47 : vector<16x1xf32> to vector<16x16xf32>
    %49 = arith.subf %45, %48 : vector<16x16xf32>
    %50 = math.exp %49 : vector<16x16xf32>
    %cst_24 = arith.constant dense<0.000000e+00> : vector<16xf32>
    %51 = vector.multi_reduction <add>, %50, %cst_24 [1] : vector<16x16xf32> to vector<16xf32>
    %52 = vector.shape_cast %51 : vector<16xf32> to vector<16x1xf32>
    %53 = vector.broadcast %52 : vector<16x1xf32> to vector<16x16xf32>
    %54 = arith.divf %50, %53 : vector<16x16xf32>
    %cst_25 = arith.constant dense<0.000000e+00> : vector<16x8xf32>
    %55 = tpu.matmul %54, %43, %cst_25 {dimension_numbers = #tpu.dot_dimension_numbers<[1], [0], [0], [1], [0, 0, 1, 1], [], []>} : vector<16x16xf32>, vector<16x8xf32>, vector<16x8xf32> -> vector<16x8xf32>
    %56 = vector.extract_strided_slice %23 {offsets = [0, 16], sizes = [16, 8], strides = [1, 1]} : vector<16x32xf32> to vector<16x8xf32>
    %57 = vector.extract_strided_slice %24 {offsets = [0, 16], sizes = [16, 8], strides = [1, 1]} : vector<16x32xf32> to vector<16x8xf32>
    %58 = vector.extract_strided_slice %25 {offsets = [0, 16], sizes = [16, 8], strides = [1, 1]} : vector<16x32xf32> to vector<16x8xf32>
    %cst_26 = arith.constant dense<0.000000e+00> : vector<16x16xf32>
    %59 = tpu.matmul %56, %57, %cst_26 {dimension_numbers = #tpu.dot_dimension_numbers<[1], [1], [0], [0], [0, 0, 1, 0], [], []>} : vector<16x8xf32>, vector<16x8xf32>, vector<16x16xf32> -> vector<16x16xf32>
    %60 = arith.addf %59, %1 : vector<16x16xf32>
    %cst_27 = arith.constant dense<0xFF800000> : vector<16xf32>
    %61 = vector.multi_reduction <maximumf>, %60, %cst_27 [1] : vector<16x16xf32> to vector<16xf32>
    %62 = vector.shape_cast %61 : vector<16xf32> to vector<16x1xf32>
    %63 = vector.broadcast %62 : vector<16x1xf32> to vector<16x16xf32>
    %64 = arith.subf %60, %63 : vector<16x16xf32>
    %65 = math.exp %64 : vector<16x16xf32>
    %cst_28 = arith.constant dense<0.000000e+00> : vector<16xf32>
    %66 = vector.multi_reduction <add>, %65, %cst_28 [1] : vector<16x16xf32> to vector<16xf32>
    %67 = vector.shape_cast %66 : vector<16xf32> to vector<16x1xf32>
    %68 = vector.broadcast %67 : vector<16x1xf32> to vector<16x16xf32>
    %69 = arith.divf %65, %68 : vector<16x16xf32>
    %cst_29 = arith.constant dense<0.000000e+00> : vector<16x8xf32>
    %70 = tpu.matmul %69, %58, %cst_29 {dimension_numbers = #tpu.dot_dimension_numbers<[1], [0], [0], [1], [0, 0, 1, 1], [], []>} : vector<16x16xf32>, vector<16x8xf32>, vector<16x8xf32> -> vector<16x8xf32>
    %71 = vector.extract_strided_slice %23 {offsets = [0, 24], sizes = [16, 8], strides = [1, 1]} : vector<16x32xf32> to vector<16x8xf32>
    %72 = vector.extract_strided_slice %24 {offsets = [0, 24], sizes = [16, 8], strides = [1, 1]} : vector<16x32xf32> to vector<16x8xf32>
    %73 = vector.extract_strided_slice %25 {offsets = [0, 24], sizes = [16, 8], strides = [1, 1]} : vector<16x32xf32> to vector<16x8xf32>
    %cst_30 = arith.constant dense<0.000000e+00> : vector<16x16xf32>
    %74 = tpu.matmul %71, %72, %cst_30 {dimension_numbers = #tpu.dot_dimension_numbers<[1], [1], [0], [0], [0, 0, 1, 0], [], []>} : vector<16x8xf32>, vector<16x8xf32>, vector<16x16xf32> -> vector<16x16xf32>
    %75 = arith.addf %74, %1 : vector<16x16xf32>
    %cst_31 = arith.constant dense<0xFF800000> : vector<16xf32>
    %76 = vector.multi_reduction <maximumf>, %75, %cst_31 [1] : vector<16x16xf32> to vector<16xf32>
    %77 = vector.shape_cast %76 : vector<16xf32> to vector<16x1xf32>
    %78 = vector.broadcast %77 : vector<16x1xf32> to vector<16x16xf32>
    %79 = arith.subf %75, %78 : vector<16x16xf32>
    %80 = math.exp %79 : vector<16x16xf32>
    %cst_32 = arith.constant dense<0.000000e+00> : vector<16xf32>
    %81 = vector.multi_reduction <add>, %80, %cst_32 [1] : vector<16x16xf32> to vector<16xf32>
    %82 = vector.shape_cast %81 : vector<16xf32> to vector<16x1xf32>
    %83 = vector.broadcast %82 : vector<16x1xf32> to vector<16x16xf32>
    %84 = arith.divf %80, %83 : vector<16x16xf32>
    %cst_33 = arith.constant dense<0.000000e+00> : vector<16x8xf32>
    %85 = tpu.matmul %84, %73, %cst_33 {dimension_numbers = #tpu.dot_dimension_numbers<[1], [0], [0], [1], [0, 0, 1, 1], [], []>} : vector<16x16xf32>, vector<16x8xf32>, vector<16x8xf32> -> vector<16x8xf32>
    %86 = tpu.concatenate %40, %55, %70, %85 in 1 : vector<16x8xf32>, vector<16x8xf32>, vector<16x8xf32>, vector<16x8xf32> -> vector<16x32xf32>
    %cst_34 = arith.constant dense<0.000000e+00> : vector<16x32xf32>
    %87 = tpu.matmul %86, %5, %cst_34 {dimension_numbers = #tpu.dot_dimension_numbers<[1], [0], [0], [1], [0, 0, 1, 1], [], []>} : vector<16x32xf32>, vector<32x32xf32>, vector<16x32xf32> -> vector<16x32xf32>
    %88 = vector.broadcast %13 : vector<1x32xf32> to vector<16x32xf32>
    %89 = arith.addf %87, %88 : vector<16x32xf32>
    %90 = arith.addf %89, %0 : vector<16x32xf32>
    %cst_35 = arith.constant dense<0.000000e+00> : vector<16xf32>
    %91 = vector.multi_reduction <add>, %90, %cst_35 [1] : vector<16x32xf32> to vector<16xf32>
    %92 = vector.shape_cast %91 : vector<16xf32> to vector<16x1xf32>
    %cst_36 = arith.constant 3.200000e+01 : f32
    %93 = vector.broadcast %cst_36 : f32 to vector<16x1xf32>
    %94 = arith.divf %92, %93 : vector<16x1xf32>
    %95 = vector.broadcast %94 : vector<16x1xf32> to vector<16x32xf32>
    %96 = arith.subf %90, %95 : vector<16x32xf32>
    %97 = arith.mulf %96, %96 : vector<16x32xf32>
    %cst_37 = arith.constant dense<0.000000e+00> : vector<16xf32>
    %98 = vector.multi_reduction <add>, %97, %cst_37 [1] : vector<16x32xf32> to vector<16xf32>
    %99 = vector.shape_cast %98 : vector<16xf32> to vector<16x1xf32>
    %cst_38 = arith.constant 3.200000e+01 : f32
    %100 = vector.broadcast %cst_38 : f32 to vector<16x1xf32>
    %101 = arith.divf %99, %100 : vector<16x1xf32>
    %cst_39 = arith.constant 9.99999996E-13 : f32
    %102 = vector.broadcast %cst_39 : f32 to vector<16x1xf32>
    %103 = arith.addf %101, %102 : vector<16x1xf32>
    %104 = math.rsqrt %103 : vector<16x1xf32>
    %105 = vector.broadcast %104 : vector<16x1xf32> to vector<16x32xf32>
    %106 = arith.mulf %96, %105 : vector<16x32xf32>
    %107 = vector.broadcast %14 : vector<1x32xf32> to vector<16x32xf32>
    %108 = arith.mulf %106, %107 : vector<16x32xf32>
    %109 = vector.broadcast %15 : vector<1x32xf32> to vector<16x32xf32>
    %110 = arith.addf %108, %109 : vector<16x32xf32>
    %cst_40 = arith.constant dense<0.000000e+00> : vector<16x64xf32>
    %111 = tpu.matmul %110, %7, %cst_40 {dimension_numbers = #tpu.dot_dimension_numbers<[1], [0], [0], [1], [0, 0, 1, 1], [], []>} : vector<16x32xf32>, vector<32x64xf32>, vector<16x64xf32> -> vector<16x64xf32>
    %112 = vector.broadcast %16 : vector<1x64xf32> to vector<16x64xf32>
    %113 = arith.addf %111, %112 : vector<16x64xf32>
    %cst_41 = arith.constant 5.000000e-01 : f32
    %114 = vector.broadcast %cst_41 : f32 to vector<16x64xf32>
    %115 = arith.mulf %114, %113 : vector<16x64xf32>
    %cst_42 = arith.constant 4.471500e-02 : f32
    %116 = vector.broadcast %cst_42 : f32 to vector<16x64xf32>
    %117 = arith.mulf %116, %113 : vector<16x64xf32>
    %118 = arith.mulf %117, %113 : vector<16x64xf32>
    %119 = arith.mulf %118, %113 : vector<16x64xf32>
    %120 = arith.addf %113, %119 : vector<16x64xf32>
    %cst_43 = arith.constant 0.797884583 : f32
    %121 = vector.broadcast %cst_43 : f32 to vector<16x64xf32>
    %122 = arith.mulf %121, %120 : vector<16x64xf32>
    %123 = math.tanh %122 : vector<16x64xf32>
    %cst_44 = arith.constant 1.000000e+00 : f32
    %124 = vector.broadcast %cst_44 : f32 to vector<16x64xf32>
    %125 = arith.addf %124, %123 : vector<16x64xf32>
    %126 = arith.mulf %115, %125 : vector<16x64xf32>
    %cst_45 = arith.constant dense<0.000000e+00> : vector<16x32xf32>
    %127 = tpu.matmul %126, %9, %cst_45 {dimension_numbers = #tpu.dot_dimension_numbers<[1], [0], [0], [1], [0, 0, 1, 1], [], []>} : vector<16x64xf32>, vector<64x32xf32>, vector<16x32xf32> -> vector<16x32xf32>
    %128 = vector.broadcast %17 : vector<1x32xf32> to vector<16x32xf32>
    %129 = arith.addf %127, %128 : vector<16x32xf32>
    %130 = arith.addf %129, %110 : vector<16x32xf32>
    %cst_46 = arith.constant dense<0.000000e+00> : vector<16xf32>
    %131 = vector.multi_reduction <add>, %130, %cst_46 [1] : vector<16x32xf32> to vector<16xf32>
    %132 = vector.shape_cast %131 : vector<16xf32> to vector<16x1xf32>
    %cst_47 = arith.constant 3.200000e+01 : f32
    %133 = vector.broadcast %cst_47 : f32 to vector<16x1xf32>
    %134 = arith.divf %132, %133 : vector<16x1xf32>
    %135 = vector.broadcast %134 : vector<16x1xf32> to vector<16x32xf32>
    %136 = arith.subf %130, %135 : vector<16x32xf32>
    %137 = arith.mulf %136, %136 : vector<16x32xf32>
    %cst_48 = arith.constant dense<0.000000e+00> : vector<16xf32>
    %138 = vector.multi_reduction <add>, %137, %cst_48 [1] : vector<16x32xf32> to vector<16xf32>
    %139 = vector.shape_cast %138 : vector<16xf32> to vector<16x1xf32>
    %cst_49 = arith.constant 3.200000e+01 : f32
    %140 = vector.broadcast %cst_49 : f32 to vector<16x1xf32>
    %141 = arith.divf %139, %140 : vector<16x1xf32>
    %cst_50 = arith.constant 9.99999996E-13 : f32
    %142 = vector.broadcast %cst_50 : f32 to vector<16x1xf32>
    %143 = arith.addf %141, %142 : vector<16x1xf32>
    %144 = math.rsqrt %143 : vector<16x1xf32>
    %145 = vector.broadcast %144 : vector<16x1xf32> to vector<16x32xf32>
    %146 = arith.mulf %136, %145 : vector<16x32xf32>
    %147 = vector.broadcast %18 : vector<1x32xf32> to vector<16x32xf32>
    %148 = arith.mulf %146, %147 : vector<16x32xf32>
    %149 = vector.broadcast %19 : vector<1x32xf32> to vector<16x32xf32>
    %150 = arith.addf %148, %149 : vector<16x32xf32>
    %c1 = arith.constant 1 : index
    %c0_51 = arith.constant 0 : index
    %c0_52 = arith.constant 0 : index
    %151 = vector.load %arg2[%c1, %c0_51, %c0_52] : memref<2x32x96xf32, #tpu.memory_space<vmem>>, vector<1x32x96xf32>
    %152 = vector.shape_cast %151 : vector<1x32x96xf32> to vector<32x96xf32>
    %c1_53 = arith.constant 1 : index
    %c0_54 = arith.constant 0 : index
    %c0_55 = arith.constant 0 : index
    %153 = vector.load %arg3[%c1_53, %c0_54, %c0_55] : memref<2x32x32xf32, #tpu.memory_space<vmem>>, vector<1x32x32xf32>
    %154 = vector.shape_cast %153 : vector<1x32x32xf32> to vector<32x32xf32>
    %c1_56 = arith.constant 1 : index
    %c0_57 = arith.constant 0 : index
    %c0_58 = arith.constant 0 : index
    %155 = vector.load %arg4[%c1_56, %c0_57, %c0_58] : memref<2x32x64xf32, #tpu.memory_space<vmem>>, vector<1x32x64xf32>
    %156 = vector.shape_cast %155 : vector<1x32x64xf32> to vector<32x64xf32>
    %c1_59 = arith.constant 1 : index
    %c0_60 = arith.constant 0 : index
    %c0_61 = arith.constant 0 : index
    %157 = vector.load %arg5[%c1_59, %c0_60, %c0_61] : memref<2x64x32xf32, #tpu.memory_space<vmem>>, vector<1x64x32xf32>
    %158 = vector.shape_cast %157 : vector<1x64x32xf32> to vector<64x32xf32>
    %c1_62 = arith.constant 1 : index
    %c0_63 = arith.constant 0 : index
    %c0_64 = arith.constant 0 : index
    %159 = vector.load %arg6[%c1_62, %c0_63, %c0_64] : memref<2x4x96xf32, #tpu.memory_space<vmem>>, vector<1x4x96xf32>
    %160 = vector.shape_cast %159 : vector<1x4x96xf32> to vector<4x96xf32>
    %161 = vector.extract_strided_slice %160 {offsets = [0, 0], sizes = [1, 96], strides = [1, 1]} : vector<4x96xf32> to vector<1x96xf32>
    %162 = vector.extract_strided_slice %160 {offsets = [1, 0], sizes = [1, 32], strides = [1, 1]} : vector<4x96xf32> to vector<1x32xf32>
    %163 = vector.extract_strided_slice %160 {offsets = [1, 32], sizes = [1, 32], strides = [1, 1]} : vector<4x96xf32> to vector<1x32xf32>
    %164 = vector.extract_strided_slice %160 {offsets = [1, 64], sizes = [1, 32], strides = [1, 1]} : vector<4x96xf32> to vector<1x32xf32>
    %165 = vector.extract_strided_slice %160 {offsets = [2, 0], sizes = [1, 64], strides = [1, 1]} : vector<4x96xf32> to vector<1x64xf32>
    %166 = vector.extract_strided_slice %160 {offsets = [2, 64], sizes = [1, 32], strides = [1, 1]} : vector<4x96xf32> to vector<1x32xf32>
    %167 = vector.extract_strided_slice %160 {offsets = [3, 0], sizes = [1, 32], strides = [1, 1]} : vector<4x96xf32> to vector<1x32xf32>
    %168 = vector.extract_strided_slice %160 {offsets = [3, 32], sizes = [1, 32], strides = [1, 1]} : vector<4x96xf32> to vector<1x32xf32>
    %cst_65 = arith.constant dense<0.000000e+00> : vector<16x96xf32>
    %169 = tpu.matmul %150, %152, %cst_65 {dimension_numbers = #tpu.dot_dimension_numbers<[1], [0], [0], [1], [0, 0, 1, 1], [], []>} : vector<16x32xf32>, vector<32x96xf32>, vector<16x96xf32> -> vector<16x96xf32>
    %170 = vector.broadcast %161 : vector<1x96xf32> to vector<16x96xf32>
    %171 = arith.addf %169, %170 : vector<16x96xf32>
    %172 = vector.extract_strided_slice %171 {offsets = [0, 0], sizes = [16, 32], strides = [1, 1]} : vector<16x96xf32> to vector<16x32xf32>
    %173 = vector.extract_strided_slice %171 {offsets = [0, 32], sizes = [16, 32], strides = [1, 1]} : vector<16x96xf32> to vector<16x32xf32>
    %174 = vector.extract_strided_slice %171 {offsets = [0, 64], sizes = [16, 32], strides = [1, 1]} : vector<16x96xf32> to vector<16x32xf32>
    %175 = vector.extract_strided_slice %172 {offsets = [0, 0], sizes = [16, 8], strides = [1, 1]} : vector<16x32xf32> to vector<16x8xf32>
    %176 = vector.extract_strided_slice %173 {offsets = [0, 0], sizes = [16, 8], strides = [1, 1]} : vector<16x32xf32> to vector<16x8xf32>
    %177 = vector.extract_strided_slice %174 {offsets = [0, 0], sizes = [16, 8], strides = [1, 1]} : vector<16x32xf32> to vector<16x8xf32>
    %cst_66 = arith.constant dense<0.000000e+00> : vector<16x16xf32>
    %178 = tpu.matmul %175, %176, %cst_66 {dimension_numbers = #tpu.dot_dimension_numbers<[1], [1], [0], [0], [0, 0, 1, 0], [], []>} : vector<16x8xf32>, vector<16x8xf32>, vector<16x16xf32> -> vector<16x16xf32>
    %179 = arith.addf %178, %1 : vector<16x16xf32>
    %cst_67 = arith.constant dense<0xFF800000> : vector<16xf32>
    %180 = vector.multi_reduction <maximumf>, %179, %cst_67 [1] : vector<16x16xf32> to vector<16xf32>
    %181 = vector.shape_cast %180 : vector<16xf32> to vector<16x1xf32>
    %182 = vector.broadcast %181 : vector<16x1xf32> to vector<16x16xf32>
    %183 = arith.subf %179, %182 : vector<16x16xf32>
    %184 = math.exp %183 : vector<16x16xf32>
    %cst_68 = arith.constant dense<0.000000e+00> : vector<16xf32>
    %185 = vector.multi_reduction <add>, %184, %cst_68 [1] : vector<16x16xf32> to vector<16xf32>
    %186 = vector.shape_cast %185 : vector<16xf32> to vector<16x1xf32>
    %187 = vector.broadcast %186 : vector<16x1xf32> to vector<16x16xf32>
    %188 = arith.divf %184, %187 : vector<16x16xf32>
    %cst_69 = arith.constant dense<0.000000e+00> : vector<16x8xf32>
    %189 = tpu.matmul %188, %177, %cst_69 {dimension_numbers = #tpu.dot_dimension_numbers<[1], [0], [0], [1], [0, 0, 1, 1], [], []>} : vector<16x16xf32>, vector<16x8xf32>, vector<16x8xf32> -> vector<16x8xf32>
    %190 = vector.extract_strided_slice %172 {offsets = [0, 8], sizes = [16, 8], strides = [1, 1]} : vector<16x32xf32> to vector<16x8xf32>
    %191 = vector.extract_strided_slice %173 {offsets = [0, 8], sizes = [16, 8], strides = [1, 1]} : vector<16x32xf32> to vector<16x8xf32>
    %192 = vector.extract_strided_slice %174 {offsets = [0, 8], sizes = [16, 8], strides = [1, 1]} : vector<16x32xf32> to vector<16x8xf32>
    %cst_70 = arith.constant dense<0.000000e+00> : vector<16x16xf32>
    %193 = tpu.matmul %190, %191, %cst_70 {dimension_numbers = #tpu.dot_dimension_numbers<[1], [1], [0], [0], [0, 0, 1, 0], [], []>} : vector<16x8xf32>, vector<16x8xf32>, vector<16x16xf32> -> vector<16x16xf32>
    %194 = arith.addf %193, %1 : vector<16x16xf32>
    %cst_71 = arith.constant dense<0xFF800000> : vector<16xf32>
    %195 = vector.multi_reduction <maximumf>, %194, %cst_71 [1] : vector<16x16xf32> to vector<16xf32>
    %196 = vector.shape_cast %195 : vector<16xf32> to vector<16x1xf32>
    %197 = vector.broadcast %196 : vector<16x1xf32> to vector<16x16xf32>
    %198 = arith.subf %194, %197 : vector<16x16xf32>
    %199 = math.exp %198 : vector<16x16xf32>
    %cst_72 = arith.constant dense<0.000000e+00> : vector<16xf32>
    %200 = vector.multi_reduction <add>, %199, %cst_72 [1] : vector<16x16xf32> to vector<16xf32>
    %201 = vector.shape_cast %200 : vector<16xf32> to vector<16x1xf32>
    %202 = vector.broadcast %201 : vector<16x1xf32> to vector<16x16xf32>
    %203 = arith.divf %199, %202 : vector<16x16xf32>
    %cst_73 = arith.constant dense<0.000000e+00> : vector<16x8xf32>
    %204 = tpu.matmul %203, %192, %cst_73 {dimension_numbers = #tpu.dot_dimension_numbers<[1], [0], [0], [1], [0, 0, 1, 1], [], []>} : vector<16x16xf32>, vector<16x8xf32>, vector<16x8xf32> -> vector<16x8xf32>
    %205 = vector.extract_strided_slice %172 {offsets = [0, 16], sizes = [16, 8], strides = [1, 1]} : vector<16x32xf32> to vector<16x8xf32>
    %206 = vector.extract_strided_slice %173 {offsets = [0, 16], sizes = [16, 8], strides = [1, 1]} : vector<16x32xf32> to vector<16x8xf32>
    %207 = vector.extract_strided_slice %174 {offsets = [0, 16], sizes = [16, 8], strides = [1, 1]} : vector<16x32xf32> to vector<16x8xf32>
    %cst_74 = arith.constant dense<0.000000e+00> : vector<16x16xf32>
    %208 = tpu.matmul %205, %206, %cst_74 {dimension_numbers = #tpu.dot_dimension_numbers<[1], [1], [0], [0], [0, 0, 1, 0], [], []>} : vector<16x8xf32>, vector<16x8xf32>, vector<16x16xf32> -> vector<16x16xf32>
    %209 = arith.addf %208, %1 : vector<16x16xf32>
    %cst_75 = arith.constant dense<0xFF800000> : vector<16xf32>
    %210 = vector.multi_reduction <maximumf>, %209, %cst_75 [1] : vector<16x16xf32> to vector<16xf32>
    %211 = vector.shape_cast %210 : vector<16xf32> to vector<16x1xf32>
    %212 = vector.broadcast %211 : vector<16x1xf32> to vector<16x16xf32>
    %213 = arith.subf %209, %212 : vector<16x16xf32>
    %214 = math.exp %213 : vector<16x16xf32>
    %cst_76 = arith.constant dense<0.000000e+00> : vector<16xf32>
    %215 = vector.multi_reduction <add>, %214, %cst_76 [1] : vector<16x16xf32> to vector<16xf32>
    %216 = vector.shape_cast %215 : vector<16xf32> to vector<16x1xf32>
    %217 = vector.broadcast %216 : vector<16x1xf32> to vector<16x16xf32>
    %218 = arith.divf %214, %217 : vector<16x16xf32>
    %cst_77 = arith.constant dense<0.000000e+00> : vector<16x8xf32>
    %219 = tpu.matmul %218, %207, %cst_77 {dimension_numbers = #tpu.dot_dimension_numbers<[1], [0], [0], [1], [0, 0, 1, 1], [], []>} : vector<16x16xf32>, vector<16x8xf32>, vector<16x8xf32> -> vector<16x8xf32>
    %220 = vector.extract_strided_slice %172 {offsets = [0, 24], sizes = [16, 8], strides = [1, 1]} : vector<16x32xf32> to vector<16x8xf32>
    %221 = vector.extract_strided_slice %173 {offsets = [0, 24], sizes = [16, 8], strides = [1, 1]} : vector<16x32xf32> to vector<16x8xf32>
    %222 = vector.extract_strided_slice %174 {offsets = [0, 24], sizes = [16, 8], strides = [1, 1]} : vector<16x32xf32> to vector<16x8xf32>
    %cst_78 = arith.constant dense<0.000000e+00> : vector<16x16xf32>
    %223 = tpu.matmul %220, %221, %cst_78 {dimension_numbers = #tpu.dot_dimension_numbers<[1], [1], [0], [0], [0, 0, 1, 0], [], []>} : vector<16x8xf32>, vector<16x8xf32>, vector<16x16xf32> -> vector<16x16xf32>
    %224 = arith.addf %223, %1 : vector<16x16xf32>
    %cst_79 = arith.constant dense<0xFF800000> : vector<16xf32>
    %225 = vector.multi_reduction <maximumf>, %224, %cst_79 [1] : vector<16x16xf32> to vector<16xf32>
    %226 = vector.shape_cast %225 : vector<16xf32> to vector<16x1xf32>
    %227 = vector.broadcast %226 : vector<16x1xf32> to vector<16x16xf32>
    %228 = arith.subf %224, %227 : vector<16x16xf32>
    %229 = math.exp %228 : vector<16x16xf32>
    %cst_80 = arith.constant dense<0.000000e+00> : vector<16xf32>
    %230 = vector.multi_reduction <add>, %229, %cst_80 [1] : vector<16x16xf32> to vector<16xf32>
    %231 = vector.shape_cast %230 : vector<16xf32> to vector<16x1xf32>
    %232 = vector.broadcast %231 : vector<16x1xf32> to vector<16x16xf32>
    %233 = arith.divf %229, %232 : vector<16x16xf32>
    %cst_81 = arith.constant dense<0.000000e+00> : vector<16x8xf32>
    %234 = tpu.matmul %233, %222, %cst_81 {dimension_numbers = #tpu.dot_dimension_numbers<[1], [0], [0], [1], [0, 0, 1, 1], [], []>} : vector<16x16xf32>, vector<16x8xf32>, vector<16x8xf32> -> vector<16x8xf32>
    %235 = tpu.concatenate %189, %204, %219, %234 in 1 : vector<16x8xf32>, vector<16x8xf32>, vector<16x8xf32>, vector<16x8xf32> -> vector<16x32xf32>
    %cst_82 = arith.constant dense<0.000000e+00> : vector<16x32xf32>
    %236 = tpu.matmul %235, %154, %cst_82 {dimension_numbers = #tpu.dot_dimension_numbers<[1], [0], [0], [1], [0, 0, 1, 1], [], []>} : vector<16x32xf32>, vector<32x32xf32>, vector<16x32xf32> -> vector<16x32xf32>
    %237 = vector.broadcast %162 : vector<1x32xf32> to vector<16x32xf32>
    %238 = arith.addf %236, %237 : vector<16x32xf32>
    %239 = arith.addf %238, %150 : vector<16x32xf32>
    %cst_83 = arith.constant dense<0.000000e+00> : vector<16xf32>
    %240 = vector.multi_reduction <add>, %239, %cst_83 [1] : vector<16x32xf32> to vector<16xf32>
    %241 = vector.shape_cast %240 : vector<16xf32> to vector<16x1xf32>
    %cst_84 = arith.constant 3.200000e+01 : f32
    %242 = vector.broadcast %cst_84 : f32 to vector<16x1xf32>
    %243 = arith.divf %241, %242 : vector<16x1xf32>
    %244 = vector.broadcast %243 : vector<16x1xf32> to vector<16x32xf32>
    %245 = arith.subf %239, %244 : vector<16x32xf32>
    %246 = arith.mulf %245, %245 : vector<16x32xf32>
    %cst_85 = arith.constant dense<0.000000e+00> : vector<16xf32>
    %247 = vector.multi_reduction <add>, %246, %cst_85 [1] : vector<16x32xf32> to vector<16xf32>
    %248 = vector.shape_cast %247 : vector<16xf32> to vector<16x1xf32>
    %cst_86 = arith.constant 3.200000e+01 : f32
    %249 = vector.broadcast %cst_86 : f32 to vector<16x1xf32>
    %250 = arith.divf %248, %249 : vector<16x1xf32>
    %cst_87 = arith.constant 9.99999996E-13 : f32
    %251 = vector.broadcast %cst_87 : f32 to vector<16x1xf32>
    %252 = arith.addf %250, %251 : vector<16x1xf32>
    %253 = math.rsqrt %252 : vector<16x1xf32>
    %254 = vector.broadcast %253 : vector<16x1xf32> to vector<16x32xf32>
    %255 = arith.mulf %245, %254 : vector<16x32xf32>
    %256 = vector.broadcast %163 : vector<1x32xf32> to vector<16x32xf32>
    %257 = arith.mulf %255, %256 : vector<16x32xf32>
    %258 = vector.broadcast %164 : vector<1x32xf32> to vector<16x32xf32>
    %259 = arith.addf %257, %258 : vector<16x32xf32>
    %cst_88 = arith.constant dense<0.000000e+00> : vector<16x64xf32>
    %260 = tpu.matmul %259, %156, %cst_88 {dimension_numbers = #tpu.dot_dimension_numbers<[1], [0], [0], [1], [0, 0, 1, 1], [], []>} : vector<16x32xf32>, vector<32x64xf32>, vector<16x64xf32> -> vector<16x64xf32>
    %261 = vector.broadcast %165 : vector<1x64xf32> to vector<16x64xf32>
    %262 = arith.addf %260, %261 : vector<16x64xf32>
    %cst_89 = arith.constant 5.000000e-01 : f32
    %263 = vector.broadcast %cst_89 : f32 to vector<16x64xf32>
    %264 = arith.mulf %263, %262 : vector<16x64xf32>
    %cst_90 = arith.constant 4.471500e-02 : f32
    %265 = vector.broadcast %cst_90 : f32 to vector<16x64xf32>
    %266 = arith.mulf %265, %262 : vector<16x64xf32>
    %267 = arith.mulf %266, %262 : vector<16x64xf32>
    %268 = arith.mulf %267, %262 : vector<16x64xf32>
    %269 = arith.addf %262, %268 : vector<16x64xf32>
    %cst_91 = arith.constant 0.797884583 : f32
    %270 = vector.broadcast %cst_91 : f32 to vector<16x64xf32>
    %271 = arith.mulf %270, %269 : vector<16x64xf32>
    %272 = math.tanh %271 : vector<16x64xf32>
    %cst_92 = arith.constant 1.000000e+00 : f32
    %273 = vector.broadcast %cst_92 : f32 to vector<16x64xf32>
    %274 = arith.addf %273, %272 : vector<16x64xf32>
    %275 = arith.mulf %264, %274 : vector<16x64xf32>
    %cst_93 = arith.constant dense<0.000000e+00> : vector<16x32xf32>
    %276 = tpu.matmul %275, %158, %cst_93 {dimension_numbers = #tpu.dot_dimension_numbers<[1], [0], [0], [1], [0, 0, 1, 1], [], []>} : vector<16x64xf32>, vector<64x32xf32>, vector<16x32xf32> -> vector<16x32xf32>
    %277 = vector.broadcast %166 : vector<1x32xf32> to vector<16x32xf32>
    %278 = arith.addf %276, %277 : vector<16x32xf32>
    %279 = arith.addf %278, %259 : vector<16x32xf32>
    %cst_94 = arith.constant dense<0.000000e+00> : vector<16xf32>
    %280 = vector.multi_reduction <add>, %279, %cst_94 [1] : vector<16x32xf32> to vector<16xf32>
    %281 = vector.shape_cast %280 : vector<16xf32> to vector<16x1xf32>
    %cst_95 = arith.constant 3.200000e+01 : f32
    %282 = vector.broadcast %cst_95 : f32 to vector<16x1xf32>
    %283 = arith.divf %281, %282 : vector<16x1xf32>
    %284 = vector.broadcast %283 : vector<16x1xf32> to vector<16x32xf32>
    %285 = arith.subf %279, %284 : vector<16x32xf32>
    %286 = arith.mulf %285, %285 : vector<16x32xf32>
    %cst_96 = arith.constant dense<0.000000e+00> : vector<16xf32>
    %287 = vector.multi_reduction <add>, %286, %cst_96 [1] : vector<16x32xf32> to vector<16xf32>
    %288 = vector.shape_cast %287 : vector<16xf32> to vector<16x1xf32>
    %cst_97 = arith.constant 3.200000e+01 : f32
    %289 = vector.broadcast %cst_97 : f32 to vector<16x1xf32>
    %290 = arith.divf %288, %289 : vector<16x1xf32>
    %cst_98 = arith.constant 9.99999996E-13 : f32
    %291 = vector.broadcast %cst_98 : f32 to vector<16x1xf32>
    %292 = arith.addf %290, %291 : vector<16x1xf32>
    %293 = math.rsqrt %292 : vector<16x1xf32>
    %294 = vector.broadcast %293 : vector<16x1xf32> to vector<16x32xf32>
    %295 = arith.mulf %285, %294 : vector<16x32xf32>
    %296 = vector.broadcast %167 : vector<1x32xf32> to vector<16x32xf32>
    %297 = arith.mulf %295, %296 : vector<16x32xf32>
    %298 = vector.broadcast %168 : vector<1x32xf32> to vector<16x32xf32>
    %299 = arith.addf %297, %298 : vector<16x32xf32>
    %c0_99 = arith.constant 0 : index
    %c0_100 = arith.constant 0 : index
    %300 = vector.load %arg7[%c0_99, %c0_100] : memref<16x32xf32, #tpu.memory_space<vmem>>, vector<16x32xf32>
    tpu.vector_store %arg7[%c0_99, %c0_100], %299 {strides = array<i32>} : memref<16x32xf32, #tpu.memory_space<vmem>>, vector<16x32xf32>,
    return
  }
}

</mosaic_0001>

<bundles_post_ra>
// kernel: tpu_custom_call.1
= control target key start
LH: loop header
LB: loop body
LE: loop exit
PB: predicated region body
PF: predicated region fallthrough
CT: control target
= control target key end

     0   :  { %12 = vsyncpa [#allocation3], 0  ;;  %s2670_s0 = inlined_call_operand.hbm [shape: f32[16,32], index: 0, kind: input, shape index: {}]   ;;  %s2671_s1 = inlined_call_operand.hbm [shape: f32[16,16], index: 1, kind: input, shape index: {}]   ;;  %s2672_s2 = inlined_call_operand.vmem [shape: f32[2,32,96], index: 2, kind: input, shape index: {}]   ;;  %s2673_s3 = inlined_call_operand.vmem [shape: f32[2,32,32], index: 3, kind: input, shape index: {}]   ;;  %s2674_s4 = inlined_call_operand.vmem [shape: f32[2,32,64], index: 4, kind: input, shape index: {}]   ;;  %s2675_s5 = inlined_call_operand.vmem [shape: f32[2,64,32], index: 5, kind: input, shape index: {}]   ;;  %s2676_s6 = inlined_call_operand.hbm [shape: f32[2,4,96], index: 6, kind: input, shape index: {}]   ;;  %s2677_s7 = inlined_call_operand.hbm [shape: f32[16,32], index: 7, kind: output, shape index: {}]  }
   0x1   :  { %13 = vsyncpa [#allocation6], 0 }
   0x2   :  { %14 = vsyncpa [#allocation4], 0  ;;  %s32_s26 = sshll.u32 %s2671_s1, 4  ;;  %s2036_s27 = smov [#allocation5]   ;;  %s33_s26 = int_to_ptr.hbm [resolvable:$true] %s32_s26 }
   0x3   :  { %s34_s28 = sshll.u32 %s2036_s27, 4  ;;  %s19_s8 = sshll.u32 %s2670_s0, 4  ;;  %s35_s28 = int_to_ptr.vmem [resolvable:$true] %s34_s28  ;;  %s20_s8 = int_to_ptr.hbm [resolvable:$true] %s19_s8 }
   0x4   :  { %s2037_s9 = smov 128   ;;  %s2038_s10 = smov 8  }
   0x5   :  { %40 = dma.hbm_to_vmem [thread:$0]  %s33_s26, 256, %s35_s28, [#allocation6], %s2037_s9, %s2037_s9, %s2038_s10  }
   0x6   :  { %s2039_s11 = smov [#allocation2]   ;;  %s53_s1 = sshll.u32 %s2676_s6, 4  ;;  %s54_s1 = int_to_ptr.hbm [resolvable:$true] %s53_s1 }
   0x7   :  { %s21_s12 = sshll.u32 %s2039_s11, 4  ;;  %s2040_s0 = smov [#allocation7]   ;;  %s22_s12 = int_to_ptr.vmem [resolvable:$true] %s21_s12 }
   0x8   :  { %27 = dma.hbm_to_vmem [thread:$0]  %s20_s8, 256, %s22_s12, [#allocation3], %s2037_s9, %s2037_s9, %s2038_s10  }
   0x9   :  { %s55_s15 = sshll.u32 %s2040_s0, 4  ;;  %s2041_s16 = smov 64   ;;  %s56_s15 = int_to_ptr.vmem [resolvable:$true] %s55_s15 }
   0xa   :  { %s2042_s17 = smov 4  }
   0xb   :  { %61 = dma.hbm_to_vmem [thread:$0]  %s54_s1, 128, %s56_s15, [#allocation6], %s2041_s16, %s2041_s16, %s2042_s17  }
   0xc   :  { %2030 = dma.done.wait [#allocation3], 256  }
   0xd   :  { %2031 = vsyncadd [#allocation3], 4294967040 }
   0xe   :  { %2032 = dma.done.wait [#allocation6], 384  }
   0xf   :  { %2033 = vsyncadd [#allocation6], 4294966912  ;;  %v81_v0 = vld [vmem:[%s2672_s2 + $0x18] sm:$0xff]  ;;  %v80_v1 = vld [vmem:[%s2672_s2 + $0x10] sm:$0xff]  ;;  %vm100_vm0 = vcmask 261120   ;;  %s2043_s25 = smov 120  }
  0x10   :  { %119 = vmatpush.msra.mxu0 %v81_v0  ;;  %v79_v2 = vld [vmem:[%s2672_s2 + $0x8] sm:$0xff]  ;;  %v78_v3 = vld [vmem:[%s2672_s2] sm:$0xff]  ;;  %s2044_s26 = smov 88   ;;  %s2045_s27 = smov 96   ;;  %vm136_vm1 = vcmask 64512   ;;  %v76_v26 = vld [vmem:[#allocation5] sm:$0xff] }
  0x11   :  { %v2126_v4 = vld [vmem:[#allocation2] sm:$0xff]  ;;  %v2130_v5 = vld [vmem:[#allocation2 + $0x8] sm:$0xff]  ;;  %s2046_s28 = smov 104   ;;  %s2047_s29 = smov 72   ;;  %vm168_vm2 = vcmask 130048   ;;  %v77_v31 = vld [vmem:[#allocation5 + $0x8] sm:$0xff] }
  0x12   :  { %120 = vmatpush.msra.mxu0 %v80_v1  ;;  %v2134_v6 = vld [vmem:[#allocation7] sm:$0xf]  ;;  %s2048_s30 = smov 80   ;;  %s2049_s8 = smov 112  }
  0x13   :  { %v99_v7 = vperm.slane %v2134_v6, 0  ;;  %s2050_s11 = smov 56   ;;  %s2051_s12 = smov 48  }
  0x14   :  { %121 = vmatpush.msra.mxu0 %v79_v2  ;;  %s2052_s13 = smov 40   ;;  %s2053_s14 = smov 16  }
  0x15   :  { %s2054_s1 = smov 24  }
  0x16   :  { %122 = vmatpush.msra.mxu0 %v78_v3 }
  0x17   :  { %1697 = vmatmul.msk.f32.vlgmr.msra.gmra.mxu0 %vm100_vm0, %v2126_v4 }
  0x1f   :  { %1698 = vmatmul.msk.f32.gmra.mxu0 %vm100_vm0, %v2130_v5 }
  0x94   :  { %v124_v8 = vpop.f32.mrf.mxu0 }
  0x95   :  { %v2137_v9 = vadd.f32 %v124_v8, %v99_v7 }
  0x97   :  { %252 = vrot.lane.b32.xlu2 %v2137_v9, %s2043_s25 }
  0x9c   :  { %v127_v10 = vpop.f32.mrf.mxu0 }
  0x9d   :  { %v2141_v11 = vadd.f32 %v127_v10, %v99_v7 }
  0x9f   :  { %258 = vrot.lane.b32.xlu1 %v2141_v11, %s2044_s26  ;;  %134 = vrot.lane.b32.xlu0 %v2141_v11, %s2045_s27  ;;  %v1807_v52 = vpack.i.bf16 %v2137_v9, %v2141_v11 }
  0xa0   :  { %254 = vrot.lane.b32.xlu2 %v2141_v11, %s2043_s25 }
  0xa7   :  { %256 = vrot.lane.b32.xlu1 %v2137_v9, %s2044_s26  ;;  %132 = vrot.lane.b32.xlu0 %v2137_v9, %s2045_s27 }
  0xa8   :  { %496 = vrot.lane.b32.xlu2 %v2137_v9, %s2046_s28 }
  0xaf   :  { %500 = vrot.lane.b32.xlu1 %v2137_v9, %s2047_s29  ;;  %502 = vrot.lane.b32.xlu0 %v2141_v11, %s2047_s29 }
  0xb0   :  { %498 = vrot.lane.b32.xlu2 %v2141_v11, %s2046_s28 }
  0xb7   :  { %378 = vrot.lane.b32.xlu1 %v2137_v9, %s2048_s30  ;;  %380 = vrot.lane.b32.xlu0 %v2141_v11, %s2048_s30 }
  0xbf   :  { %376 = vrot.lane.b32.xlu1 %v2141_v11, %s2049_s8  ;;  %374 = vrot.lane.b32.xlu0 %v2137_v9, %s2049_s8 }
  0xf1   :  { %v253_v14 = vpop.permute.xlu2 %252 }
  0xfa   :  { %v255_v17 = vpop.permute.xlu2 %254 }
 0x102   :  { %v497_v21 = vpop.permute.xlu2 %496 }
 0x10a   :  { %v499_v24 = vpop.permute.xlu2 %498 }
 0x111   :  { %v259_v12 = vpop.permute.xlu1 %258  ;;  %v135_v13 = vpop.permute.xlu0 %134 }
 0x112   :  { %1699 = vmatpush.xpose.msk.msra.mxu1 %vm136_vm1, %v135_v13  ;;  %1705 = vmatpush.xpose.msk.msra.mxu3 %vm136_vm1, %v259_v12 }
 0x119   :  { %v257_v15 = vpop.permute.xlu1 %256  ;;  %v133_v16 = vpop.permute.xlu0 %132 }
 0x11a   :  { %1700 = vmatpush.xpose.msk.msra.mxu1 %vm136_vm1, %v133_v16  ;;  %1706 = vmatpush.xpose.msk.msra.mxu3 %vm136_vm1, %v257_v15 }
 0x11d   :  { %1701 = vmatmul.msk.f32.vlgmr.msra.gmra.mxu1 %vm136_vm1, %v2137_v9  ;;  %1707 = vmatmul.msk.f32.vlgmr.msra.gmra.mxu3 %vm136_vm1, %v253_v14 }
 0x121   :  { %v503_v18 = vpop.permute.xlu0 %502  ;;  %v501_v19 = vpop.permute.xlu1 %500 }
 0x122   :  { %1717 = vmatpush.xpose.msk.msrb.mxu3 %vm136_vm1, %v503_v18 }
 0x125   :  { %1702 = vmatmul.msk.f32.gmra.mxu1 %vm136_vm1, %v2141_v11  ;;  %1708 = vmatmul.msk.f32.gmra.mxu3 %vm136_vm1, %v255_v17 }
 0x126   :  { %1718 = vmatpush.xpose.msk.msrb.mxu3 %vm136_vm1, %v501_v19 }
 0x129   :  { %v381_v20 = vpop.permute.xlu0 %380  ;;  %v379_v22 = vpop.permute.xlu1 %378 }
 0x12a   :  { %1711 = vmatpush.xpose.msk.msrb.mxu0 %vm136_vm1, %v381_v20 }
 0x12d   :  { %1719 = vmatmul.msk.f32.vlgmr.msrb.gmra.mxu3 %vm136_vm1, %v497_v21 }
 0x12e   :  { %1712 = vmatpush.xpose.msk.msrb.mxu0 %vm136_vm1, %v379_v22 }
 0x131   :  { %v375_v23 = vpop.permute.xlu0 %374  ;;  %v377_v25 = vpop.permute.xlu1 %376 }
 0x132   :  { %1713 = vmatmul.msk.f32.vlgmr.msrb.gmra.mxu0 %vm136_vm1, %v375_v23 }
 0x135   :  { %1720 = vmatmul.msk.f32.gmra.mxu3 %vm136_vm1, %v499_v24 }
 0x13a   :  { %1714 = vmatmul.msk.f32.gmra.mxu0 %vm136_vm1, %v377_v25 }
 0x19a   :  { %v162_v27 = vpop.f32.mrf.mxu1 }
 0x19b   :  { %v163_v28 = vadd.f32 %v162_v27, %v76_v26 }
 0x19d   :  { %v169_v29 = vsel %vm168_vm2, %v163_v28, -inf }
 0x19e   :  { %170 = vmax.xlane.f32.xlu2 %v169_v29 }
 0x1a0   :  { %v285_v30 = vpop.f32.mrf.mxu3 }
 0x1a1   :  { %v286_v32 = vadd.f32 %v285_v30, %v76_v26 }
 0x1a2   :  { %v165_v33 = vpop.f32.mrf.mxu1 }
 0x1a3   :  { %v166_v34 = vadd.f32 %v165_v33, %v77_v31  ;;  %v291_v35 = vsel %vm168_vm2, %v286_v32, -inf }
 0x1a4   :  { %292 = vmax.xlane.f32.xlu1 %v291_v35 }
 0x1a5   :  { %v172_v36 = vsel %vm168_vm2, %v166_v34, -inf }
 0x1a6   :  { %173 = vmax.xlane.f32.xlu0 %v172_v36 }
 0x1a8   :  { %v288_v37 = vpop.f32.mrf.mxu3 }
 0x1a9   :  { %v289_v48 = vadd.f32 %v288_v37, %v77_v31 }
 0x1ab   :  { %v294_v49 = vsel %vm168_vm2, %v289_v48, -inf }
 0x1af   :  { %v407_v38 = vpop.f32.mrf.mxu0 }
 0x1b0   :  { %v408_v39 = vadd.f32 %v407_v38, %v76_v26  ;;  %v529_v40 = vpop.f32.mrf.mxu3 }
 0x1b1   :  { %v530_v50 = vadd.f32 %v529_v40, %v76_v26 }
 0x1b2   :  { %v413_v41 = vsel %vm168_vm2, %v408_v39, -inf }
 0x1b3   :  { %414 = vmax.xlane.f32.xlu0 %v413_v41  ;;  %v535_v51 = vsel %vm168_vm2, %v530_v50, -inf }
 0x1b7   :  { %v410_v42 = vpop.f32.mrf.mxu0 }
 0x1b8   :  { %v411_v43 = vadd.f32 %v410_v42, %v77_v31  ;;  %v532_v44 = vpop.f32.mrf.mxu3 }
 0x1b9   :  { %v2191_v45 = vadd.f32 %v532_v44, %v77_v31 }
 0x1ba   :  { %v416_v46 = vsel %vm168_vm2, %v411_v43, -inf }
 0x1bb   :  { %417 = vmax.xlane.f32.xlu2 %v416_v46  ;;  %v538_v47 = vsel %vm168_vm2, %v2191_v45, -inf }
 0x1bc   :  { %539 = vmax.xlane.f32.xlu1 %v538_v47 }
 0x1c3   :  { %295 = vmax.xlane.f32.xlu2 %v294_v49 }
 0x1cb   :  { %536 = vmax.xlane.f32.xlu2 %v535_v51 }
 0x1d5   :  { %1808 = vrot.lane.b32.xlu1 %v1807_v52, %s2050_s11 }
 0x211   :  { %v171_v53 = vpop.xlane.xlu2 %170 }
 0x212   :  { %v175_v54 = vsub.f32 %v163_v28, %v171_v53 }
 0x214   :  { %v177_v55 = vmul.f32 1.442695, %v175_v54 }
 0x216   :  { %1842 = vpow2.f32 %v177_v55 }
 0x217   :  { %v293_v63 = vpop.xlane.xlu1 %292 }
 0x218   :  { %v297_v2 = vsub.f32 %v286_v32, %v293_v63 }
 0x219   :  { %v174_v56 = vpop.xlane.xlu0 %173 }
 0x21a   :  { %v176_v57 = vsub.f32 %v166_v34, %v174_v56  ;;  %v299_v7 = vmul.f32 1.442695, %v297_v2 }
 0x21c   :  { %v2201_v58 = vpop.eup %1842  ;;  %v179_v59 = vmul.f32 1.442695, %v176_v57 }
 0x21d   :  { %v181_v60 = vsel %vm168_vm2, %v2201_v58, 0.0 }
 0x21e   :  { %1844 = vpow2.f32 %v179_v59  ;;  %182 = vadd.xlane.f32.xlu0 %v181_v60 }
 0x224   :  { %v2205_v61 = vpop.eup %1844 }
 0x225   :  { %v184_v62 = vsel %vm168_vm2, %v2205_v61, 0.0 }
 0x226   :  { %185 = vadd.xlane.f32.xlu1 %v184_v62  ;;  %v415_v0 = vpop.xlane.xlu0 %414 }
 0x227   :  { %v419_v1 = vsub.f32 %v408_v39, %v415_v0 }
 0x229   :  { %v421_v3 = vmul.f32 1.442695, %v419_v1 }
 0x22b   :  { %1846 = vpow2.f32 %v421_v3 }
 0x22c   :  { %1848 = vpow2.f32 %v299_v7 }
 0x22e   :  { %v418_v8 = vpop.xlane.xlu2 %417 }
 0x22f   :  { %v420_v19 = vsub.f32 %v411_v43, %v418_v8  ;;  %v540_v23 = vpop.xlane.xlu1 %539 }
 0x230   :  { %v542_v25 = vsub.f32 %v2191_v45, %v540_v23 }
 0x231   :  { %v2209_v9 = vpop.eup %1846  ;;  %v423_v22 = vmul.f32 1.442695, %v420_v19 }
 0x232   :  { %1803 = vrot.lane.b32.xlu0 %v1807_v52, %s2041_s16  ;;  %v425_v10 = vsel %vm168_vm2, %v2209_v9, 0.0  ;;  %v2214_v12 = vpop.eup %1848  ;;  %v545_v27 = vmul.f32 1.442695, %v542_v25 }
 0x233   :  { %426 = vadd.xlane.f32.xlu2 %v425_v10  ;;  %v303_v15 = vsel %vm168_vm2, %v2214_v12, 0.0 }
 0x236   :  { %v296_v11 = vpop.xlane.xlu2 %295 }
 0x237   :  { %v298_v13 = vsub.f32 %v289_v48, %v296_v11 }
 0x239   :  { %v301_v14 = vmul.f32 1.442695, %v298_v13 }
 0x23b   :  { %1850 = vpow2.f32 %v301_v14  ;;  %304 = vadd.xlane.f32.xlu2 %v303_v15 }
 0x23e   :  { %v537_v16 = vpop.xlane.xlu2 %536 }
 0x23f   :  { %v541_v17 = vsub.f32 %v530_v50, %v537_v16 }
 0x241   :  { %v2218_v18 = vpop.eup %1850  ;;  %v543_v20 = vmul.f32 1.442695, %v541_v17 }
 0x242   :  { %v306_v21 = vsel %vm168_vm2, %v2218_v18, 0.0 }
 0x243   :  { %1852 = vpow2.f32 %v543_v20  ;;  %307 = vadd.xlane.f32.xlu1 %v306_v21 }
 0x244   :  { %1854 = vpow2.f32 %v423_v22 }
 0x245   :  { %1856 = vpow2.f32 %v545_v27 }
 0x247   :  { %v1809_v32 = vpop.permute.xlu1 %1808 }
 0x248   :  { %v1810_v57 = vunpack.i.l.bf16 %v1809_v32  ;;  %v1811_v62 = vunpack.i.h.bf16 %v1809_v32 }
 0x249   :  { %v2222_v24 = vpop.eup %1852 }
 0x24a   :  { %v547_v26 = vsel %vm168_vm2, %v2222_v24, 0.0  ;;  %v2227_v28 = vpop.eup %1854 }
 0x24b   :  { %548 = vadd.xlane.f32.xlu2 %v547_v26  ;;  %v428_v29 = vsel %vm168_vm2, %v2227_v28, 0.0  ;;  %v2231_v30 = vpop.eup %1856 }
 0x24c   :  { %v550_v31 = vsel %vm168_vm2, %v2231_v30, 0.0 }
 0x253   :  { %429 = vadd.xlane.f32.xlu2 %v428_v29 }
 0x25c   :  { %551 = vadd.xlane.f32.xlu0 %v550_v31  ;;  %1818 = vrot.lane.b32.xlu1 %v1807_v52, %s2051_s12 }
 0x26b   :  { %1813 = vrot.lane.b32.xlu2 %v1807_v52, %s2052_s13 }
 0x291   :  { %v183_v33 = vpop.xlane.xlu0 %182 }
 0x292   :  { %1858 = vrcp.f32 %v183_v33  ;;  %v198_v39 = vand.u32 2147483648, %v183_v33  ;;  %vm192_vm4 = vweird.f32 %v183_v33  ;;  %v196_v42 = vand.u32 2147483647, %v183_v33 }
 0x294   :  { %v199_v45 = vor.u32 1.1754944e-38, %v198_v39  ;;  %vm197_vm6 = vcmp.eq.f32.partialorder %v196_v42, 8.507059e+37 }
 0x298   :  { %v1859_v34 = vpop.eup %1858 }
 0x299   :  { %v188_v35 = vmul.f32 %v1859_v34, %v183_v33  ;;  %v186_v36 = vpop.xlane.xlu1 %185  ;;  %vm193_vm3 = vweird.f32 %v1859_v34 }
 0x29a   :  { %1860 = vrcp.f32 %v186_v36  ;;  %vm194_vm5 = vmor %vm192_vm4, %vm193_vm3  ;;  %v213_v52 = vand.u32 2147483648, %v186_v36  ;;  %vm207_vm8 = vweird.f32 %v186_v36  ;;  %v211_v56 = vand.u32 2147483647, %v186_v36 }
 0x29b   :  { %v189_v37 = vsub.f32 1.0, %v188_v35 }
 0x29c   :  { %v214_v60 = vor.u32 1.1754944e-38, %v213_v52  ;;  %vm212_vm10 = vcmp.eq.f32.partialorder %v211_v56, 8.507059e+37 }
 0x29d   :  { %v190_v38 = vmul.f32 %v1859_v34, %v189_v37 }
 0x29f   :  { %v191_v40 = vadd.f32 %v1859_v34, %v190_v38 }
 0x2a0   :  { %v1861_v41 = vpop.eup %1860 }
 0x2a1   :  { %v203_v43 = vmul.f32 %v1861_v41, %v186_v36  ;;  %v195_v44 = vsel %vm194_vm5, %v1859_v34, %v191_v40  ;;  %vm208_vm7 = vweird.f32 %v1861_v41 }
 0x2a2   :  { %v200_v50 = vsel %vm197_vm6, %v199_v45, %v195_v44  ;;  %vm209_vm9 = vmor %vm207_vm8, %vm208_vm7 }
 0x2a3   :  { %v204_v46 = vsub.f32 1.0, %v203_v43  ;;  %v201_v54 = vmul.f32 %v2201_v58, %v200_v50 }
 0x2a4   :  { %v1804_v47 = vpop.permute.xlu0 %1803 }
 0x2a5   :  { %v205_v48 = vmul.f32 %v1861_v41, %v204_v46  ;;  %v1805_v49 = vunpack.i.l.bf16 %v1804_v47  ;;  %v1806_v53 = vunpack.i.h.bf16 %v1804_v47 }
 0x2a6   :  { %v2237_v51 = vpop.xlane.xlu2 %426 }
 0x2a7   :  { %243 = vmatpush.msra.mxu2 %v1805_v49  ;;  %v206_v55 = vadd.f32 %v1861_v41, %v205_v48  ;;  %v442_v39 = vand.u32 2147483648, %v2237_v51  ;;  %vm436_vm7 = vweird.f32 %v2237_v51  ;;  %v440_v42 = vand.u32 2147483647, %v2237_v51 }
 0x2a9   :  { %244 = vmatpush.msra.mxu2 %v1806_v53  ;;  %v210_v59 = vsel %vm209_vm9, %v1861_v41, %v206_v55  ;;  %v443_v48 = vor.u32 1.1754944e-38, %v442_v39 }
 0x2aa   :  { %1703 = vmatmul.msk.f32.vlgmr.msra.gmra.mxu2 %vm168_vm2, %v201_v54  ;;  %v215_v63 = vsel %vm212_vm10, %v214_v60, %v210_v59 }
 0x2ab   :  { %365 = vmatpush.msrb.mxu2 %v1810_v57  ;;  %v216_v1 = vmul.f32 %v2205_v61, %v215_v63 }
 0x2ad   :  { %366 = vmatpush.msrb.mxu2 %v1811_v62 }
 0x2ae   :  { %v305_v0 = vpop.xlane.xlu2 %304 }
 0x2af   :  { %1862 = vrcp.f32 %v305_v0  ;;  %v320_v11 = vand.u32 2147483648, %v305_v0  ;;  %v318_v14 = vand.u32 2147483647, %v305_v0  ;;  %vm314_vm12 = vweird.f32 %v305_v0 }
 0x2b0   :  { %1864 = vrcp.f32 %v2237_v51 }
 0x2b1   :  { %v321_v16 = vor.u32 1.1754944e-38, %v320_v11  ;;  %vm319_vm14 = vcmp.eq.f32.partialorder %v318_v14, 8.507059e+37 }
 0x2b2   :  { %1704 = vmatmul.msk.f32.gmra.mxu2 %vm168_vm2, %v216_v1 }
 0x2b5   :  { %v1863_v58 = vpop.eup %1862 }
 0x2b6   :  { %v310_v2 = vmul.f32 %v1863_v58, %v305_v0  ;;  %v308_v3 = vpop.xlane.xlu1 %307  ;;  %v2244_v7 = vpop.eup %1864  ;;  %vm315_vm11 = vweird.f32 %v1863_v58 }
 0x2b7   :  { %1866 = vrcp.f32 %v308_v3  ;;  %v432_v13 = vmul.f32 %v2244_v7, %v2237_v51  ;;  %vm316_vm13 = vmor %vm314_vm12, %vm315_vm11  ;;  %v335_v25 = vand.u32 2147483648, %v308_v3  ;;  %v333_v29 = vand.u32 2147483647, %v308_v3 }
 0x2b8   :  { %v311_v8 = vsub.f32 1.0, %v310_v2  ;;  %vm329_vm3 = vweird.f32 %v308_v3  ;;  %vm437_vm6 = vweird.f32 %v2244_v7  ;;  %vm441_vm11 = vcmp.eq.f32.partialorder %v440_v42, 8.507059e+37 }
 0x2b9   :  { %v433_v21 = vsub.f32 1.0, %v432_v13  ;;  %v336_v34 = vor.u32 1.1754944e-38, %v335_v25  ;;  %vm334_vm5 = vcmp.eq.f32.partialorder %v333_v29, 8.507059e+37  ;;  %vm2257_vm8 = vmor %vm436_vm7, %vm437_vm6 }
 0x2ba   :  { %v312_v10 = vmul.f32 %v1863_v58, %v311_v8 }
 0x2bb   :  { %v434_v31 = vmul.f32 %v2244_v7, %v433_v21 }
 0x2bc   :  { %v313_v15 = vadd.f32 %v1863_v58, %v312_v10 }
 0x2bd   :  { %v1867_v61 = vpop.eup %1866  ;;  %v435_v38 = vadd.f32 %v2244_v7, %v434_v31 }
 0x2be   :  { %v325_v17 = vmul.f32 %v1867_v61, %v308_v3  ;;  %v549_v19 = vpop.xlane.xlu2 %548  ;;  %v317_v20 = vsel %vm316_vm13, %v1863_v58, %v313_v15  ;;  %vm330_vm15 = vweird.f32 %v1867_v61 }
 0x2bf   :  { %1868 = vrcp.f32 %v549_v19  ;;  %v322_v23 = vsel %vm319_vm14, %v321_v16, %v317_v20  ;;  %vm331_vm4 = vmor %vm329_vm3, %vm330_vm15  ;;  %v564_v43 = vand.u32 2147483648, %v549_v19  ;;  %v562_v46 = vand.u32 2147483647, %v549_v19 }
 0x2c0   :  { %v326_v22 = vsub.f32 1.0, %v325_v17  ;;  %v323_v26 = vmul.f32 %v2214_v12, %v322_v23  ;;  %v439_v47 = vsel %vm2257_vm8, %v2244_v7, %v435_v38  ;;  %vm558_vm10 = vweird.f32 %v549_v19 }
 0x2c1   :  { %v565_v50 = vor.u32 1.1754944e-38, %v564_v43  ;;  %vm563_vm13 = vcmp.eq.f32.partialorder %v562_v46, 8.507059e+37  ;;  %v444_v55 = vsel %vm441_vm11, %v443_v48, %v439_v47  ;;  %v649_v48 = vperm.slane %v2134_v6, 1 }
 0x2c2   :  { %v327_v27 = vmul.f32 %v1867_v61, %v326_v22  ;;  %1709 = vmatmul.msk.f32.vlgmr.msrb.gmra.mxu2 %vm168_vm2, %v323_v26  ;;  %v445_v58 = vmul.f32 %v2209_v9, %v444_v55 }
 0x2c4   :  { %v328_v32 = vadd.f32 %v1867_v61, %v327_v27 }
 0x2c5   :  { %v1869_v33 = vpop.eup %1868 }
 0x2c6   :  { %v554_v35 = vmul.f32 %v1869_v33, %v549_v19  ;;  %v430_v36 = vpop.xlane.xlu2 %429  ;;  %v332_v37 = vsel %vm331_vm4, %v1867_v61, %v328_v32  ;;  %vm559_vm9 = vweird.f32 %v1869_v33 }
 0x2c7   :  { %1870 = vrcp.f32 %v430_v36  ;;  %v337_v12 = vsel %vm334_vm5, %v336_v34, %v332_v37  ;;  %vm560_vm12 = vmor %vm558_vm10, %vm559_vm9  ;;  %v457_v63 = vand.u32 2147483648, %v430_v36  ;;  %v455_v7 = vand.u32 2147483647, %v430_v36  ;;  %v84_v34 = vld [vmem:[%s2673_s3 + $0x10] sm:$0xff] }
 0x2c8   :  { %v555_v40 = vsub.f32 1.0, %v554_v35  ;;  %v338_v41 = vmul.f32 %v2218_v18, %v337_v12  ;;  %vm451_vm15 = vweird.f32 %v430_v36  ;;  %v83_v35 = vld [vmem:[%s2673_s3 + $0x8] sm:$0xff]  ;;  %vm646_vm9 = vcmask 195584  }
 0x2c9   :  { %v458_v10 = vor.u32 1.1754944e-38, %v457_v63  ;;  %vm456_vm4 = vcmp.eq.f32.partialorder %v455_v7, 8.507059e+37 }
 0x2ca   :  { %v556_v45 = vmul.f32 %v1869_v33, %v555_v40  ;;  %1710 = vmatmul.msk.f32.gmra.mxu2 %vm168_vm2, %v338_v41 }
 0x2cc   :  { %v557_v18 = vadd.f32 %v1869_v33, %v556_v45 }
 0x2cd   :  { %v1871_v49 = vpop.eup %1870 }
 0x2ce   :  { %v561_v51 = vsel %vm560_vm12, %v1869_v33, %v557_v18  ;;  %v447_v52 = vmul.f32 %v1871_v49, %v430_v36  ;;  %v1819_v53 = vpop.permute.xlu1 %1818  ;;  %v1814_v54 = vpop.permute.xlu2 %1813  ;;  %vm452_vm14 = vweird.f32 %v1871_v49  ;;  %v85_v33 = vld [vmem:[%s2673_s3 + $0x18] sm:$0xff]  ;;  %v82_v36 = vld [vmem:[%s2673_s3] sm:$0xff] }
 0x2cf   :  { %v566_v56 = vsel %vm563_vm13, %v565_v50, %v561_v51  ;;  %v1815_v57 = vunpack.i.l.bf16 %v1814_v54  ;;  %v552_v59 = vpop.xlane.xlu0 %551  ;;  %v1820_v60 = vunpack.i.l.bf16 %v1819_v53  ;;  %v1816_v0 = vunpack.i.h.bf16 %v1814_v54  ;;  %vm453_vm3 = vmor %vm451_vm15, %vm452_vm14  ;;  %668 = vmatpush.msra.mxu0 %v85_v33 }
 0x2d0   :  { %v448_v62 = vsub.f32 1.0, %v447_v52  ;;  %1872 = vrcp.f32 %v552_v59  ;;  %v1821_v1 = vunpack.i.h.bf16 %v1819_v53  ;;  %v567_v3 = vmul.f32 %v2222_v24, %v566_v56 }
 0x2d1   :  { %487 = vmatpush.msrb.mxu1 %v1820_v60  ;;  %609 = vmatpush.msra.mxu2 %v1815_v57  ;;  %v579_v61 = vand.u32 2147483648, %v552_v59  ;;  %v577_v17 = vand.u32 2147483647, %v552_v59  ;;  %vm573_vm6 = vweird.f32 %v552_v59  ;;  %v2055_v56 = vmov 32.0  }
 0x2d2   :  { %v449_v2 = vmul.f32 %v1871_v49, %v448_v62  ;;  %669 = vmatpush.msra.mxu0 %v84_v34  ;;  %1874 = vrcp.f32 %v2055_v56 }
 0x2d3   :  { %488 = vmatpush.msrb.mxu1 %v1821_v1  ;;  %610 = vmatpush.msra.mxu2 %v1816_v0  ;;  %v580_v20 = vor.u32 1.1754944e-38, %v579_v61  ;;  %vm578_vm8 = vcmp.eq.f32.partialorder %v577_v17, 8.507059e+37  ;;  %v87_v61 = vld [vmem:[%s2674_s4 + $0x8] sm:$0xff] }
 0x2d4   :  { %1715 = vmatmul.msk.f32.vlgmr.msrb.gmra.mxu1 %vm168_vm2, %v445_v58  ;;  %1721 = vmatmul.msk.f32.vlgmr.msra.gmra.mxu2 %vm168_vm2, %v567_v3  ;;  %v450_v8 = vadd.f32 %v1871_v49, %v449_v2 }
 0x2d5   :  { %670 = vmatpush.msra.mxu0 %v83_v35 }
 0x2d6   :  { %v1873_v11 = vpop.eup %1872  ;;  %v454_v13 = vsel %vm453_vm3, %v1871_v49, %v450_v8 }
 0x2d7   :  { %v569_v14 = vmul.f32 %v1873_v11, %v552_v59  ;;  %v459_v9 = vsel %vm456_vm4, %v458_v10, %v454_v13  ;;  %vm574_vm5 = vweird.f32 %v1873_v11  ;;  %671 = vmatpush.msra.mxu0 %v82_v36  ;;  %v89_v13 = vld [vmem:[%s2674_s4 + $0x18] sm:$0xff]  ;;  %vm795_vm4 = vcmask 523264  }
 0x2d8   :  { %v460_v24 = vmul.f32 %v2227_v28, %v459_v9  ;;  %vm575_vm7 = vmor %vm573_vm6, %vm574_vm5  ;;  %v1875_v57 = vpop.eup %1874  ;;  %762 = vmatpush.msra.mxu1 %v89_v13 }
 0x2d9   :  { %v570_v15 = vsub.f32 1.0, %v569_v14  ;;  %v688_v59 = vmul.f32 32.0, %v1875_v57  ;;  %vm692_vm10 = vweird.f32 %v1875_v57  ;;  %v88_v14 = vld [vmem:[%s2674_s4 + $0x10] sm:$0xff] }
 0x2da   :  { %763 = vmatpush.msra.mxu1 %v88_v14 }
 0x2db   :  { %v571_v16 = vmul.f32 %v1873_v11, %v570_v15  ;;  %v689_v60 = vsub.f32 1.0, %v688_v59 }
 0x2dc   :  { %1716 = vmatmul.msk.f32.gmra.mxu1 %vm168_vm2, %v460_v24 }
 0x2dd   :  { %v572_v19 = vadd.f32 %v1873_v11, %v571_v16  ;;  %v690_v62 = vmul.f32 %v1875_v57, %v689_v60  ;;  %764 = vmatpush.msra.mxu1 %v87_v61  ;;  %v86_v16 = vld [vmem:[%s2674_s4] sm:$0xff] }
 0x2df   :  { %v576_v21 = vsel %vm575_vm7, %v1873_v11, %v572_v19  ;;  %v691_v63 = vadd.f32 %v1875_v57, %v690_v62  ;;  %765 = vmatpush.msra.mxu1 %v86_v16 }
 0x2e0   :  { %v581_v22 = vsel %vm578_vm8, %v580_v20, %v576_v21 }
 0x2e1   :  { %v582_v23 = vmul.f32 %v2231_v30, %v581_v22  ;;  %v743_v22 = vperm.slane %v2134_v6, 2 }
 0x2e3   :  { %1722 = vmatmul.msk.f32.gmra.mxu2 %vm168_vm2, %v582_v23 }
 0x32d   :  { %v246_v25 = vpop.f32.mrf.mxu2 }
 0x335   :  { %v249_v26 = vpop.f32.mrf.mxu2 }
 0x345   :  { %v368_v27 = vpop.f32.mrf.mxu2 }
 0x34d   :  { %v371_v28 = vpop.f32.mrf.mxu2 }
 0x351   :  { %v490_v29 = vpop.f32.mrf.mxu1 }
 0x352   :  { %628 = vrot.lane.b32.xlu1 %v490_v29, %s2053_s14 }
 0x357   :  { %v612_v31 = vpop.f32.mrf.mxu2 }
 0x358   :  { %636 = vrot.lane.b32.xlu2 %v612_v31, %s2054_s1 }
 0x359   :  { %v493_v32 = vpop.f32.mrf.mxu1 }
 0x35a   :  { %630 = vrot.lane.b32.xlu0 %v493_v32, %s2053_s14  ;;  %620 = vrot.lane.b32.xlu1 %v368_v27, %s2038_s10 }
 0x362   :  { %622 = vrot.lane.b32.xlu1 %v371_v28, %s2038_s10 }
 0x366   :  { %v615_v30 = vpop.f32.mrf.mxu2 }
 0x367   :  { %638 = vrot.lane.b32.xlu2 %v615_v30, %s2054_s1 }
 0x3b2   :  { %v637_v39 = vpop.permute.xlu2 %636 }
 0x3c1   :  { %v639_v45 = vpop.permute.xlu2 %638 }
 0x3c4   :  { %v629_v37 = vpop.permute.xlu1 %628 }
 0x3cc   :  { %v621_v38 = vpop.permute.xlu1 %620  ;;  %v631_v43 = vpop.permute.xlu0 %630 }
 0x3cd   :  { %v642_v12 = vsel %vm136_vm1, %v246_v25, %v621_v38 }
 0x3ce   :  { %v644_v40 = vsel %vm168_vm2, %v642_v12, %v629_v37 }
 0x3cf   :  { %v647_v41 = vsel %vm646_vm9, %v644_v40, %v637_v39 }
 0x3d0   :  { %1723 = vmatmul.msk.f32.vlgmr.msra.gmra.mxu0 %vm100_vm0, %v647_v41 }
 0x3d4   :  { %v623_v42 = vpop.permute.xlu1 %622 }
 0x3d5   :  { %v643_v44 = vsel %vm136_vm1, %v249_v26, %v623_v42 }
 0x3d6   :  { %v645_v46 = vsel %vm168_vm2, %v643_v44, %v631_v43  ;;  %v97_v44 = vld [vmem:[%s2675_s5 + $0x38] sm:$0xff] }
 0x3d7   :  { %v648_v47 = vsel %vm646_vm9, %v645_v46, %v639_v45  ;;  %810 = vmatpush.msra.mxu3 %v97_v44  ;;  %v96_v45 = vld [vmem:[%s2675_s5 + $0x30] sm:$0xff]  ;;  %v95_v46 = vld [vmem:[%s2675_s5 + $0x28] sm:$0xff] }
 0x3d8   :  { %1724 = vmatmul.msk.f32.gmra.mxu0 %vm100_vm0, %v648_v47  ;;  %v94_v47 = vld [vmem:[%s2675_s5 + $0x20] sm:$0xff] }
 0x3d9   :  { %811 = vmatpush.msra.mxu3 %v96_v45 }
 0x3db   :  { %812 = vmatpush.msra.mxu3 %v95_v46 }
 0x3dd   :  { %813 = vmatpush.msra.mxu3 %v94_v47 }
 0x44d   :  { %v673_v18 = vpop.f32.mrf.mxu0 }
 0x44e   :  { %v674_v49 = vadd.f32 %v673_v18, %v649_v48  ;;  %v92_v18 = vld [vmem:[%s2675_s5 + $0x10] sm:$0xff] }
 0x450   :  { %v679_v50 = vadd.f32 %v674_v49, %v2126_v4  ;;  %v2305_v4 = vsel %vm692_vm10, %v1875_v57, %v691_v63  ;;  %v91_v49 = vld [vmem:[%s2675_s5 + $0x8] sm:$0xff] }
 0x452   :  { %v681_v51 = vsel %vm100_vm0, %v679_v50, 0.0 }
 0x453   :  { %682 = vadd.xlane.f32.xlu1 %v681_v51 }
 0x455   :  { %v676_v52 = vpop.f32.mrf.mxu0 }
 0x456   :  { %v677_v53 = vadd.f32 %v676_v52, %v649_v48 }
 0x458   :  { %v680_v54 = vadd.f32 %v677_v53, %v2130_v5 }
 0x45a   :  { %v684_v55 = vsel %vm100_vm0, %v680_v54, 0.0 }
 0x45b   :  { %685 = vadd.xlane.f32.xlu2 %v684_v55 }
 0x473   :  { %733 = vrot.lane.b32.xlu2 %v649_v48, %s2045_s27 }
 0x4c6   :  { %v683_v0 = vpop.xlane.xlu1 %682 }
 0x4c7   :  { %v694_v1 = vmul.f32 %v2305_v4, %v683_v0 }
 0x4c9   :  { %v696_v58 = vsub.f32 %v679_v50, %v694_v1  ;;  %v90_v50 = vld [vmem:[%s2675_s5] sm:$0xff] }
 0x4cb   :  { %v698_v5 = vmul.f32 %v696_v58, %v696_v58 }
 0x4cd   :  { %v700_v2 = vsel %vm100_vm0, %v698_v5, 0.0 }
 0x4ce   :  { %701 = vadd.xlane.f32.xlu0 %v700_v2  ;;  %v686_v3 = vpop.xlane.xlu2 %685 }
 0x4cf   :  { %v695_v7 = vmul.f32 %v2305_v4, %v686_v3 }
 0x4d1   :  { %v697_v8 = vsub.f32 %v680_v54, %v695_v7 }
 0x4d3   :  { %v699_v10 = vmul.f32 %v697_v8, %v697_v8 }
 0x4d5   :  { %v703_v11 = vsel %vm100_vm0, %v699_v10, 0.0 }
 0x4d6   :  { %704 = vadd.xlane.f32.xlu1 %v703_v11  ;;  %v734_v37 = vpop.permute.xlu2 %733 }
 0x4e2   :  { %792 = vrot.lane.b32.xlu0 %v743_v22, %s2041_s16 }
 0x4ef   :  { %738 = vrot.lane.b32.xlu1 %v649_v48, %s2041_s16  ;;  %v93_v48 = vld [vmem:[%s2675_s5 + $0x18] sm:$0xff] }
 0x4f0   :  { %814 = vmatpush.msra.mxu3 %v93_v48 }
 0x4f2   :  { %815 = vmatpush.msra.mxu3 %v92_v18 }
 0x4f4   :  { %816 = vmatpush.msra.mxu3 %v91_v49 }
 0x4f6   :  { %817 = vmatpush.msra.mxu3 %v90_v50 }
 0x541   :  { %v702_v9 = vpop.xlane.xlu0 %701 }
 0x542   :  { %v706_v15 = vmul.f32 %v702_v9, %v2305_v4 }
 0x544   :  { %v708_v24 = vadd.f32 1e-12, %v706_v15 }
 0x546   :  { %1876 = vrsqrt.f32 %v708_v24  ;;  %vm716_vm12 = vweird.f32 %v708_v24 }
 0x549   :  { %v705_v17 = vpop.xlane.xlu1 %704 }
 0x54a   :  { %v707_v19 = vmul.f32 %v705_v17, %v2305_v4 }
 0x54c   :  { %v1877_v20 = vpop.eup %1876  ;;  %v709_v21 = vadd.f32 1e-12, %v707_v19 }
 0x54d   :  { %v711_v23 = vmul.f32 %v1877_v20, %v708_v24  ;;  %vm717_vm11 = vweird.f32 %v1877_v20 }
 0x54e   :  { %1878 = vrsqrt.f32 %v709_v21  ;;  %vm718_vm13 = vmor %vm716_vm12, %vm717_vm11  ;;  %vm726_vm15 = vweird.f32 %v709_v21 }
 0x54f   :  { %v712_v25 = vmul.f32 %v1877_v20, %v711_v23 }
 0x551   :  { %v713_v26 = vmul.f32 0.5, %v712_v25 }
 0x553   :  { %v714_v27 = vsub.f32 1.5, %v713_v26 }
 0x554   :  { %v1879_v28 = vpop.eup %1878  ;;  %v793_v14 = vpop.permute.xlu0 %792 }
 0x555   :  { %v721_v29 = vmul.f32 %v1879_v28, %v709_v21  ;;  %v715_v31 = vmul.f32 %v1877_v20, %v714_v27  ;;  %vm727_vm14 = vweird.f32 %v1879_v28  ;;  %v871_v21 = vperm.slane %v2134_v6, 3  ;;  %v1732_v6 = vld [vmem:[%s2672_s2 + $0x38] sm:$0xff] }
 0x556   :  { %vm728_vm3 = vmor %vm726_vm15, %vm727_vm14  ;;  %925 = vmatpush.msrb.mxu2 %v1732_v6 }
 0x557   :  { %v722_v32 = vmul.f32 %v1879_v28, %v721_v29  ;;  %v719_v33 = vsel %vm718_vm13, %v1877_v20, %v715_v31 }
 0x558   :  { %v730_v35 = vmul.f32 %v719_v33, %v696_v58  ;;  %v1731_v33 = vld [vmem:[%s2672_s2 + $0x30] sm:$0xff] }
 0x559   :  { %v723_v30 = vmul.f32 0.5, %v722_v32  ;;  %926 = vmatpush.msrb.mxu2 %v1731_v33 }
 0x55a   :  { %v736_v12 = vmul.f32 %v734_v37, %v730_v35  ;;  %v1729_v35 = vld [vmem:[%s2672_s2 + $0x20] sm:$0xff] }
 0x55b   :  { %v724_v34 = vsub.f32 1.5, %v723_v30 }
 0x55d   :  { %v725_v36 = vmul.f32 %v1879_v28, %v724_v34  ;;  %v1730_v34 = vld [vmem:[%s2672_s2 + $0x28] sm:$0xff] }
 0x55e   :  { %927 = vmatpush.msrb.mxu2 %v1730_v34 }
 0x55f   :  { %v729_v38 = vsel %vm728_vm3, %v1879_v28, %v725_v36 }
 0x560   :  { %v731_v40 = vmul.f32 %v729_v38, %v697_v8  ;;  %928 = vmatpush.msrb.mxu2 %v1729_v35 }
 0x561   :  { %v739_v39 = vpop.permute.xlu1 %738 }
 0x562   :  { %v741_v41 = vadd.f32 %v739_v39, %v736_v12  ;;  %v737_v42 = vmul.f32 %v734_v37, %v731_v40 }
 0x564   :  { %1725 = vmatmul.msk.f32.vlgmr.msra.gmra.mxu1 %vm100_vm0, %v741_v41  ;;  %v742_v43 = vadd.f32 %v739_v39, %v737_v42 }
 0x56c   :  { %1726 = vmatmul.msk.f32.gmra.mxu1 %vm100_vm0, %v742_v43 }
 0x5e1   :  { %v767_v51 = vpop.f32.mrf.mxu1 }
 0x5e2   :  { %v768_v52 = vadd.f32 %v767_v51, %v743_v22 }
 0x5e4   :  { %v775_v53 = vmul.f32 0.044715, %v768_v52  ;;  %v773_v2 = vmul.f32 0.5, %v768_v52 }
 0x5e6   :  { %v777_v54 = vmul.f32 %v775_v53, %v768_v52 }
 0x5e8   :  { %v779_v55 = vmul.f32 %v777_v54, %v768_v52 }
 0x5e9   :  { %v770_v56 = vpop.f32.mrf.mxu1 }
 0x5ea   :  { %v781_v57 = vadd.f32 %v779_v55, %v768_v52  ;;  %v771_v59 = vadd.f32 %v770_v56, %v743_v22 }
 0x5ec   :  { %v783_v60 = vmul.f32 0.7978846, %v781_v57  ;;  %v776_v62 = vmul.f32 0.044715, %v771_v59  ;;  %v774_v10 = vmul.f32 0.5, %v771_v59 }
 0x5ee   :  { %1880 = vtanh.f32 %v783_v60  ;;  %v778_v63 = vmul.f32 %v776_v62, %v771_v59 }
 0x5f0   :  { %v780_v0 = vmul.f32 %v778_v63, %v771_v59  ;;  %v2386_v63 = vld [vmem:[#allocation7 + $0x4] sm:$0xf] }
 0x5f2   :  { %v782_v1 = vadd.f32 %v780_v0, %v771_v59  ;;  %v906_v0 = vperm.slane %v2386_v63, 0 }
 0x5f4   :  { %v1881_v58 = vpop.eup %1880  ;;  %v784_v5 = vmul.f32 0.7978846, %v782_v1 }
 0x5f5   :  { %v787_v3 = vadd.f32 1.0, %v1881_v58 }
 0x5f6   :  { %1882 = vtanh.f32 %v784_v5 }
 0x5f7   :  { %v789_v7 = vmul.f32 %v787_v3, %v773_v2 }
 0x5f9   :  { %1727 = vmatmul.msk.f32.vlgmr.msra.gmra.mxu3 %vm795_vm4, %v789_v7 }
 0x5fc   :  { %v1883_v8 = vpop.eup %1882 }
 0x5fd   :  { %v788_v11 = vadd.f32 1.0, %v1883_v8 }
 0x5ff   :  { %v790_v13 = vmul.f32 %v788_v11, %v774_v10 }
 0x601   :  { %1728 = vmatmul.msk.f32.gmra.mxu3 %vm795_vm4, %v790_v13 }
 0x67c   :  { %v819_v9 = vpop.f32.mrf.mxu3 }
 0x67d   :  { %v820_v15 = vadd.f32 %v819_v9, %v793_v14 }
 0x67f   :  { %v825_v61 = vadd.f32 %v820_v15, %v741_v41 }
 0x681   :  { %v827_v24 = vsel %vm100_vm0, %v825_v61, 0.0 }
 0x682   :  { %828 = vadd.xlane.f32.xlu2 %v827_v24 }
 0x684   :  { %v822_v16 = vpop.f32.mrf.mxu3 }
 0x685   :  { %v823_v17 = vadd.f32 %v822_v16, %v793_v14 }
 0x687   :  { %v826_v19 = vadd.f32 %v823_v17, %v742_v43 }
 0x689   :  { %v830_v20 = vsel %vm100_vm0, %v826_v19, 0.0 }
 0x68a   :  { %831 = vadd.xlane.f32.xlu1 %v830_v20 }
 0x6a3   :  { %875 = vrot.lane.b32.xlu1 %v871_v21, %s2045_s27 }
 0x6f5   :  { %v829_v22 = vpop.xlane.xlu2 %828 }
 0x6f6   :  { %v833_v23 = vmul.f32 %v829_v22, %v2305_v4 }
 0x6f8   :  { %v835_v25 = vsub.f32 %v825_v61, %v833_v23 }
 0x6fa   :  { %v837_v26 = vmul.f32 %v835_v25, %v835_v25 }
 0x6fc   :  { %v839_v27 = vsel %vm100_vm0, %v837_v26, 0.0 }
 0x6fd   :  { %v832_v28 = vpop.xlane.xlu1 %831  ;;  %840 = vadd.xlane.f32.xlu0 %v839_v27 }
 0x6fe   :  { %v834_v29 = vmul.f32 %v832_v28, %v2305_v4 }
 0x700   :  { %v836_v31 = vsub.f32 %v826_v19, %v834_v29  ;;  %v1933_v29 = vld [vmem:[#allocation5 + $0x8] sm:$0xff] }
 0x702   :  { %v838_v32 = vmul.f32 %v836_v31, %v836_v31 }
 0x704   :  { %v842_v30 = vsel %vm100_vm0, %v838_v32, 0.0 }
 0x705   :  { %843 = vadd.xlane.f32.xlu2 %v842_v30 }
 0x715   :  { %v876_v52 = vpop.permute.xlu1 %875 }
 0x770   :  { %v841_v36 = vpop.xlane.xlu0 %840 }
 0x771   :  { %v845_v37 = vmul.f32 %v841_v36, %v2305_v4 }
 0x773   :  { %v847_v38 = vadd.f32 1e-12, %v845_v37 }
 0x775   :  { %1884 = vrsqrt.f32 %v847_v38  ;;  %vm855_vm6 = vweird.f32 %v847_v38 }
 0x778   :  { %v844_v12 = vpop.xlane.xlu2 %843 }
 0x779   :  { %v846_v39 = vmul.f32 %v844_v12, %v2305_v4 }
 0x77b   :  { %v1885_v40 = vpop.eup %1884  ;;  %v848_v41 = vadd.f32 1e-12, %v846_v39 }
 0x77c   :  { %v850_v42 = vmul.f32 %v1885_v40, %v847_v38  ;;  %vm856_vm5 = vweird.f32 %v1885_v40 }
 0x77d   :  { %1886 = vrsqrt.f32 %v848_v41  ;;  %vm857_vm7 = vmor %vm855_vm6, %vm856_vm5  ;;  %vm865_vm10 = vweird.f32 %v848_v41 }
 0x77e   :  { %v851_v43 = vmul.f32 %v1885_v40, %v850_v42 }
 0x780   :  { %v852_v44 = vmul.f32 0.5, %v851_v43 }
 0x782   :  { %v853_v45 = vsub.f32 1.5, %v852_v44 }
 0x783   :  { %v1887_v46 = vpop.eup %1886 }
 0x784   :  { %v854_v47 = vmul.f32 %v1885_v40, %v853_v45  ;;  %v860_v48 = vmul.f32 %v1887_v46, %v848_v41  ;;  %vm866_vm8 = vweird.f32 %v1887_v46 }
 0x785   :  { %vm867_vm11 = vmor %vm865_vm10, %vm866_vm8 }
 0x786   :  { %v861_v18 = vmul.f32 %v1887_v46, %v860_v48  ;;  %v858_v49 = vsel %vm857_vm7, %v1885_v40, %v854_v47 }
 0x787   :  { %v869_v50 = vmul.f32 %v858_v49, %v835_v25 }
 0x788   :  { %v862_v51 = vmul.f32 0.5, %v861_v18 }
 0x789   :  { %v872_v53 = vmul.f32 %v871_v21, %v869_v50 }
 0x78a   :  { %v863_v54 = vsub.f32 1.5, %v862_v51 }
 0x78b   :  { %v2378_v55 = vadd.f32 %v876_v52, %v872_v53 }
 0x78c   :  { %v864_v56 = vmul.f32 %v1887_v46, %v863_v54 }
 0x78d   :  { %1749 = vmatmul.msk.f32.vlgmr.msrb.gmra.mxu2 %vm100_vm0, %v2378_v55 }
 0x78e   :  { %v868_v57 = vsel %vm867_vm11, %v1887_v46, %v864_v56 }
 0x78f   :  { %v870_v59 = vmul.f32 %v868_v57, %v836_v31 }
 0x791   :  { %v873_v60 = vmul.f32 %v871_v21, %v870_v59  ;;  %v1932_v21 = vld [vmem:[#allocation5] sm:$0xff] }
 0x793   :  { %v2382_v62 = vadd.f32 %v876_v52, %v873_v60 }
 0x795   :  { %1750 = vmatmul.msk.f32.gmra.mxu2 %vm100_vm0, %v2382_v62 }
 0x810   :  { %v930_v1 = vpop.f32.mrf.mxu2 }
 0x811   :  { %v2389_v58 = vadd.f32 %v930_v1, %v906_v0 }
 0x813   :  { %1060 = vrot.lane.b32.xlu0 %v2389_v58, %s2044_s26 }
 0x818   :  { %v933_v5 = vpop.f32.mrf.mxu2 }
 0x819   :  { %v2393_v2 = vadd.f32 %v933_v5, %v906_v0 }
 0x81b   :  { %1056 = vrot.lane.b32.xlu0 %v2389_v58, %s2043_s25  ;;  %940 = vrot.lane.b32.xlu1 %v2393_v2, %s2045_s27  ;;  %v2449_v45 = vpack.i.bf16 %v2389_v58, %v2393_v2 }
 0x81c   :  { %1062 = vrot.lane.b32.xlu2 %v2393_v2, %s2044_s26 }
 0x823   :  { %1058 = vrot.lane.b32.xlu0 %v2393_v2, %s2043_s25  ;;  %1306 = vrot.lane.b32.xlu1 %v2393_v2, %s2047_s29 }
 0x824   :  { %938 = vrot.lane.b32.xlu2 %v2389_v58, %s2045_s27 }
 0x82b   :  { %1300 = vrot.lane.b32.xlu0 %v2389_v58, %s2046_s28  ;;  %1184 = vrot.lane.b32.xlu1 %v2393_v2, %s2048_s30 }
 0x82c   :  { %1304 = vrot.lane.b32.xlu2 %v2389_v58, %s2047_s29 }
 0x833   :  { %1302 = vrot.lane.b32.xlu0 %v2393_v2, %s2046_s28  ;;  %1178 = vrot.lane.b32.xlu1 %v2389_v58, %s2049_s8 }
 0x834   :  { %1182 = vrot.lane.b32.xlu2 %v2389_v58, %s2048_s30 }
 0x83c   :  { %1180 = vrot.lane.b32.xlu2 %v2393_v2, %s2049_s8 }
 0x876   :  { %v1063_v3 = vpop.permute.xlu2 %1062 }
 0x877   :  { %1757 = vmatpush.xpose.msk.msrb.mxu3 %vm136_vm1, %v1063_v3 }
 0x87e   :  { %v939_v8 = vpop.permute.xlu2 %938 }
 0x885   :  { %v1061_v7 = vpop.permute.xlu0 %1060 }
 0x886   :  { %1758 = vmatpush.xpose.msk.msrb.mxu3 %vm136_vm1, %v1061_v7  ;;  %v1305_v9 = vpop.permute.xlu2 %1304 }
 0x88d   :  { %v1057_v10 = vpop.permute.xlu0 %1056  ;;  %v941_v11 = vpop.permute.xlu1 %940 }
 0x88e   :  { %1751 = vmatpush.xpose.msk.msrb.mxu0 %vm136_vm1, %v941_v11  ;;  %1759 = vmatmul.msk.f32.vlgmr.msrb.gmra.mxu3 %vm136_vm1, %v1057_v10  ;;  %v1183_v24 = vpop.permute.xlu2 %1182 }
 0x892   :  { %1752 = vmatpush.xpose.msk.msrb.mxu0 %vm136_vm1, %v939_v8 }
 0x895   :  { %v1059_v13 = vpop.permute.xlu0 %1058  ;;  %v1307_v14 = vpop.permute.xlu1 %1306  ;;  %1753 = vmatmul.msk.f32.vlgmr.msrb.gmra.mxu0 %vm136_vm1, %v2389_v58 }
 0x896   :  { %1760 = vmatmul.msk.f32.gmra.mxu3 %vm136_vm1, %v1059_v13  ;;  %v1181_v19 = vpop.permute.xlu2 %1180 }
 0x897   :  { %1769 = vmatpush.xpose.msk.msra.mxu3 %vm136_vm1, %v1307_v14 }
 0x89b   :  { %1770 = vmatpush.xpose.msk.msra.mxu3 %vm136_vm1, %v1305_v9 }
 0x89d   :  { %v1301_v15 = vpop.permute.xlu0 %1300  ;;  %v1185_v61 = vpop.permute.xlu1 %1184  ;;  %1754 = vmatmul.msk.f32.gmra.mxu0 %vm136_vm1, %v2393_v2 }
 0x89e   :  { %1763 = vmatpush.xpose.msk.msra.mxu0 %vm136_vm1, %v1185_v61  ;;  %1771 = vmatmul.msk.f32.vlgmr.msra.gmra.mxu3 %vm136_vm1, %v1301_v15 }
 0x8a2   :  { %1764 = vmatpush.xpose.msk.msra.mxu0 %vm136_vm1, %v1183_v24 }
 0x8a5   :  { %v1303_v16 = vpop.permute.xlu0 %1302  ;;  %v1179_v17 = vpop.permute.xlu1 %1178 }
 0x8a6   :  { %1765 = vmatmul.msk.f32.vlgmr.msra.gmra.mxu0 %vm136_vm1, %v1179_v17  ;;  %1772 = vmatmul.msk.f32.gmra.mxu3 %vm136_vm1, %v1303_v16 }
 0x8ae   :  { %1766 = vmatmul.msk.f32.gmra.mxu0 %vm136_vm1, %v1181_v19 }
 0x911   :  { %v1089_v20 = vpop.f32.mrf.mxu3 }
 0x912   :  { %v1090_v22 = vadd.f32 %v1932_v21, %v1089_v20  ;;  %v967_v23 = vpop.f32.mrf.mxu0 }
 0x913   :  { %v968_v25 = vadd.f32 %v1932_v21, %v967_v23 }
 0x914   :  { %v1095_v26 = vsel %vm168_vm2, %v1090_v22, -inf }
 0x915   :  { %1096 = vmax.xlane.f32.xlu0 %v1095_v26  ;;  %v973_v27 = vsel %vm168_vm2, %v968_v25, -inf }
 0x916   :  { %974 = vmax.xlane.f32.xlu1 %v973_v27 }
 0x919   :  { %v1092_v28 = vpop.f32.mrf.mxu3 }
 0x91a   :  { %v1093_v31 = vadd.f32 %v1933_v29, %v1092_v28  ;;  %v970_v32 = vpop.f32.mrf.mxu0 }
 0x91b   :  { %v971_v30 = vadd.f32 %v1933_v29, %v970_v32 }
 0x91c   :  { %v1098_v6 = vsel %vm168_vm2, %v1093_v31, -inf }
 0x91d   :  { %1099 = vmax.xlane.f32.xlu2 %v1098_v6  ;;  %v976_v33 = vsel %vm168_vm2, %v971_v30, -inf }
 0x91e   :  { %977 = vmax.xlane.f32.xlu0 %v976_v33 }
 0x921   :  { %v1333_v34 = vpop.f32.mrf.mxu3 }
 0x922   :  { %v1334_v35 = vadd.f32 %v1932_v21, %v1333_v34 }
 0x923   :  { %v1211_v36 = vpop.f32.mrf.mxu0 }
 0x924   :  { %v1212_v37 = vadd.f32 %v1932_v21, %v1211_v36  ;;  %v1339_v38 = vsel %vm168_vm2, %v1334_v35, -inf }
 0x925   :  { %1340 = vmax.xlane.f32.xlu1 %v1339_v38 }
 0x926   :  { %v1217_v12 = vsel %vm168_vm2, %v1212_v37, -inf }
 0x927   :  { %1218 = vmax.xlane.f32.xlu2 %v1217_v12 }
 0x929   :  { %v1336_v39 = vpop.f32.mrf.mxu3 }
 0x92a   :  { %v1337_v40 = vadd.f32 %v1933_v29, %v1336_v39 }
 0x92b   :  { %v1214_v41 = vpop.f32.mrf.mxu0 }
 0x92c   :  { %v1215_v42 = vadd.f32 %v1933_v29, %v1214_v41  ;;  %v1342_v43 = vsel %vm168_vm2, %v1337_v40, -inf }
 0x92d   :  { %1343 = vmax.xlane.f32.xlu0 %v1342_v43 }
 0x92e   :  { %v1220_v44 = vsel %vm168_vm2, %v1215_v42, -inf }
 0x92f   :  { %1221 = vmax.xlane.f32.xlu1 %v1220_v44 }
 0x948   :  { %1823 = vrot.lane.b32.xlu1 %v2449_v45, %s2050_s11 }
 0x988   :  { %v1097_v46 = vpop.xlane.xlu0 %1096 }
 0x989   :  { %v1101_v47 = vsub.f32 %v1090_v22, %v1097_v46  ;;  %v975_v48 = vpop.xlane.xlu1 %974 }
 0x98a   :  { %v979_v18 = vsub.f32 %v968_v25, %v975_v48 }
 0x98b   :  { %v1103_v49 = vmul.f32 1.442695, %v1101_v47 }
 0x98c   :  { %v981_v50 = vmul.f32 1.442695, %v979_v18 }
 0x98d   :  { %1888 = vpow2.f32 %v1103_v49 }
 0x98e   :  { %1890 = vpow2.f32 %v981_v50 }
 0x990   :  { %v1100_v51 = vpop.xlane.xlu2 %1099 }
 0x991   :  { %v1102_v52 = vsub.f32 %v1093_v31, %v1100_v51  ;;  %v978_v53 = vpop.xlane.xlu0 %977 }
 0x992   :  { %v980_v54 = vsub.f32 %v971_v30, %v978_v53 }
 0x993   :  { %v2453_v56 = vpop.eup %1888  ;;  %v1105_v57 = vmul.f32 1.442695, %v1102_v52 }
 0x994   :  { %v2455_v59 = vpop.eup %1890  ;;  %v983_v60 = vmul.f32 1.442695, %v980_v54  ;;  %v1107_v0 = vsel %vm168_vm2, %v2453_v56, 0.0 }
 0x995   :  { %1892 = vpow2.f32 %v1105_v57  ;;  %1108 = vadd.xlane.f32.xlu2 %v1107_v0  ;;  %v985_v1 = vsel %vm168_vm2, %v2455_v59, 0.0 }
 0x996   :  { %1894 = vpow2.f32 %v983_v60  ;;  %986 = vadd.xlane.f32.xlu0 %v985_v1 }
 0x998   :  { %v1341_v58 = vpop.xlane.xlu1 %1340 }
 0x999   :  { %v1345_v5 = vsub.f32 %v1334_v35, %v1341_v58 }
 0x99a   :  { %v1219_v2 = vpop.xlane.xlu2 %1218 }
 0x99b   :  { %v2461_v3 = vpop.eup %1892  ;;  %v1347_v7 = vmul.f32 1.442695, %v1345_v5  ;;  %v1223_v8 = vsub.f32 %v1212_v37, %v1219_v2 }
 0x99c   :  { %v2463_v10 = vpop.eup %1894  ;;  %v1110_v11 = vsel %vm168_vm2, %v2461_v3, 0.0 }
 0x99d   :  { %1896 = vpow2.f32 %v1347_v7  ;;  %v1225_v13 = vmul.f32 1.442695, %v1223_v8  ;;  %1111 = vadd.xlane.f32.xlu1 %v1110_v11  ;;  %v988_v14 = vsel %vm168_vm2, %v2463_v10, 0.0 }
 0x99e   :  { %989 = vadd.xlane.f32.xlu2 %v988_v14 }
 0x99f   :  { %1898 = vpow2.f32 %v1225_v13 }
 0x9a0   :  { %v1344_v9 = vpop.xlane.xlu0 %1343 }
 0x9a1   :  { %v1346_v19 = vsub.f32 %v1337_v40, %v1344_v9 }
 0x9a2   :  { %v1222_v15 = vpop.xlane.xlu1 %1221 }
 0x9a3   :  { %v2469_v61 = vpop.eup %1896  ;;  %v1224_v24 = vsub.f32 %v1215_v42, %v1222_v15  ;;  %v1349_v22 = vmul.f32 1.442695, %v1346_v19 }
 0x9a4   :  { %v1351_v16 = vsel %vm168_vm2, %v2469_v61, 0.0 }
 0x9a5   :  { %v2473_v17 = vpop.eup %1898  ;;  %v1227_v20 = vmul.f32 1.442695, %v1224_v24  ;;  %1352 = vadd.xlane.f32.xlu0 %v1351_v16 }
 0x9a6   :  { %v1229_v21 = vsel %vm168_vm2, %v2473_v17, 0.0 }
 0x9a7   :  { %1900 = vpow2.f32 %v1227_v20  ;;  %1230 = vadd.xlane.f32.xlu2 %v1229_v21 }
 0x9a8   :  { %1902 = vpow2.f32 %v1349_v22 }
 0x9ad   :  { %v2477_v23 = vpop.eup %1900 }
 0x9ae   :  { %v1232_v25 = vsel %vm168_vm2, %v2477_v23, 0.0  ;;  %v2481_v26 = vpop.eup %1902 }
 0x9af   :  { %1233 = vadd.xlane.f32.xlu2 %v1232_v25  ;;  %v1354_v27 = vsel %vm168_vm2, %v2481_v26, 0.0 }
 0x9b6   :  { %1833 = vrot.lane.b32.xlu1 %v2449_v45, %s2052_s13 }
 0x9b7   :  { %1355 = vadd.xlane.f32.xlu2 %v1354_v27 }
 0x9b9   :  { %1828 = vrot.lane.b32.xlu0 %v2449_v45, %s2041_s16 }
 0x9ba   :  { %v1824_v28 = vpop.permute.xlu1 %1823 }
 0x9bb   :  { %v1825_v29 = vunpack.i.l.bf16 %v1824_v28  ;;  %v1826_v31 = vunpack.i.h.bf16 %v1824_v28 }
 0x9bd   :  { %1169 = vmatpush.msra.mxu2 %v1825_v29 }
 0x9bf   :  { %1170 = vmatpush.msra.mxu2 %v1826_v31 }
 0x9cf   :  { %1838 = vrot.lane.b32.xlu2 %v2449_v45, %s2051_s12 }
 0xa08   :  { %v1109_v32 = vpop.xlane.xlu2 %1108 }
 0xa09   :  { %1904 = vrcp.f32 %v1109_v32  ;;  %v2491_v30 = vpop.xlane.xlu0 %986  ;;  %v1124_v12 = vand.u32 2147483648, %v1109_v32  ;;  %v1122_v39 = vand.u32 2147483647, %v1109_v32  ;;  %vm1118_vm13 = vweird.f32 %v1109_v32 }
 0xa0a   :  { %1906 = vrcp.f32 %v2491_v30  ;;  %vm996_vm11 = vweird.f32 %v2491_v30  ;;  %v1002_v20 = vand.u32 2147483648, %v2491_v30 }
 0xa0b   :  { %v1125_v44 = vor.u32 1.1754944e-38, %v1124_v12  ;;  %vm1123_vm15 = vcmp.eq.f32.partialorder %v1122_v39, 8.507059e+37 }
 0xa0f   :  { %v1905_v6 = vpop.eup %1904 }
 0xa10   :  { %v1114_v33 = vmul.f32 %v1905_v6, %v1109_v32  ;;  %v1112_v34 = vpop.xlane.xlu1 %1111  ;;  %v2496_v37 = vpop.eup %1906  ;;  %vm1119_vm12 = vweird.f32 %v1905_v6 }
 0xa11   :  { %1908 = vrcp.f32 %v1112_v34  ;;  %v2494_v35 = vpop.xlane.xlu2 %989  ;;  %vm1120_vm14 = vmor %vm1118_vm13, %vm1119_vm12  ;;  %v992_v42 = vmul.f32 %v2496_v37, %v2491_v30  ;;  %v1139_v50 = vand.u32 2147483648, %v1112_v34  ;;  %v1137_v52 = vand.u32 2147483647, %v1112_v34 }
 0xa12   :  { %v1115_v36 = vsub.f32 1.0, %v1114_v33  ;;  %1910 = vrcp.f32 %v2494_v35  ;;  %vm1133_vm5 = vweird.f32 %v1112_v34  ;;  %vm997_vm8 = vweird.f32 %v2496_v37 }
 0xa13   :  { %v993_v49 = vsub.f32 1.0, %v992_v42  ;;  %v1140_v1 = vor.u32 1.1754944e-38, %v1139_v50  ;;  %vm1138_vm7 = vcmp.eq.f32.partialorder %v1137_v52, 8.507059e+37  ;;  %vm2519_vm12 = vmor %vm996_vm11, %vm997_vm8  ;;  %v1017_v42 = vand.u32 2147483648, %v2494_v35 }
 0xa14   :  { %v1116_v38 = vmul.f32 %v1905_v6, %v1115_v36 }
 0xa15   :  { %v994_v0 = vmul.f32 %v2496_v37, %v993_v49  ;;  %v1018_v49 = vor.u32 1.1754944e-38, %v1017_v42 }
 0xa16   :  { %v1117_v40 = vadd.f32 %v1905_v6, %v1116_v38 }
 0xa17   :  { %v1909_v41 = vpop.eup %1908  ;;  %v995_v13 = vadd.f32 %v2496_v37, %v994_v0 }
 0xa18   :  { %v1121_v43 = vsel %vm1120_vm14, %v1905_v6, %v1117_v40  ;;  %v1129_v45 = vmul.f32 %v1909_v41, %v1112_v34  ;;  %v1353_v46 = vpop.xlane.xlu0 %1352  ;;  %vm1134_vm3 = vweird.f32 %v1909_v41  ;;  %v2504_v54 = vpop.eup %1910 }
 0xa19   :  { %1912 = vrcp.f32 %v1353_v46  ;;  %v1126_v47 = vsel %vm1123_vm15, %v1125_v44, %v1121_v43  ;;  %vm1135_vm6 = vmor %vm1133_vm5, %vm1134_vm3  ;;  %v1007_v2 = vmul.f32 %v2504_v54, %v2494_v35  ;;  %v1368_v9 = vand.u32 2147483648, %v1353_v46 }
 0xa1a   :  { %v1130_v48 = vsub.f32 1.0, %v1129_v45  ;;  %v2501_v18 = vpop.xlane.xlu2 %1230  ;;  %v1127_v53 = vmul.f32 %v2453_v56, %v1126_v47  ;;  %v1366_v24 = vand.u32 2147483647, %v1353_v46  ;;  %vm1362_vm13 = vweird.f32 %v1353_v46 }
 0xa1b   :  { %1914 = vrcp.f32 %v2501_v18  ;;  %v1008_v15 = vsub.f32 1.0, %v1007_v2  ;;  %v999_v22 = vsel %vm2519_vm12, %v2496_v37, %v995_v13  ;;  %v1369_v27 = vor.u32 1.1754944e-38, %v1368_v9 }
 0xa1c   :  { %v1131_v51 = vmul.f32 %v1909_v41, %v1130_v48  ;;  %1761 = vmatmul.msk.f32.vlgmr.msra.gmra.mxu2 %vm168_vm2, %v1127_v53  ;;  %vm1367_vm15 = vcmp.eq.f32.partialorder %v1366_v24, 8.507059e+37  ;;  %vm1012_vm5 = vweird.f32 %v2504_v54  ;;  %v1015_v45 = vand.u32 2147483647, %v2494_v35 }
 0xa1d   :  { %v1009_v29 = vmul.f32 %v2504_v54, %v1008_v15  ;;  %vm1240_vm12 = vweird.f32 %v2501_v18 }
 0xa1e   :  { %v1132_v57 = vadd.f32 %v1909_v41, %v1131_v51  ;;  %vm1016_vm8 = vcmp.eq.f32.partialorder %v1015_v45, 8.507059e+37 }
 0xa1f   :  { %v1913_v60 = vpop.eup %1912  ;;  %v1010_v40 = vadd.f32 %v2504_v54, %v1009_v29 }
 0xa20   :  { %v1358_v58 = vmul.f32 %v1913_v60, %v1353_v46  ;;  %v1136_v5 = vsel %vm1135_vm6, %v1909_v41, %v1132_v57  ;;  %vm1363_vm10 = vweird.f32 %v1913_v60  ;;  %vm1011_vm6 = vweird.f32 %v2494_v35 }
 0xa21   :  { %v1141_v56 = vsel %vm1138_vm7, %v1140_v1, %v1136_v5  ;;  %v2517_v16 = vpop.eup %1914  ;;  %vm1364_vm14 = vmor %vm1362_vm13, %vm1363_vm10  ;;  %v1246_v1 = vand.u32 2147483648, %v2501_v18  ;;  %v1244_v5 = vand.u32 2147483647, %v2501_v18 }
 0xa22   :  { %v1359_v7 = vsub.f32 1.0, %v1358_v58  ;;  %v2511_v8 = vpop.xlane.xlu2 %1233  ;;  %v1142_v11 = vmul.f32 %v2461_v3, %v1141_v56  ;;  %v1000_v3 = vand.u32 2147483647, %v2491_v30  ;;  %v1236_v31 = vmul.f32 %v2517_v16, %v2501_v18  ;;  %vm1013_vm7 = vmor %vm1011_vm6, %vm1012_vm5 }
 0xa23   :  { %1916 = vrcp.f32 %v2511_v8  ;;  %v1003_v30 = vor.u32 1.1754944e-38, %v1002_v20  ;;  %v1014_v48 = vsel %vm1013_vm7, %v2504_v54, %v1010_v40  ;;  %vm1241_vm10 = vweird.f32 %v2517_v16 }
 0xa24   :  { %v1360_v14 = vmul.f32 %v1913_v60, %v1359_v7  ;;  %1762 = vmatmul.msk.f32.gmra.mxu2 %vm168_vm2, %v1142_v11  ;;  %vm1001_vm3 = vcmp.eq.f32.partialorder %v1000_v3, 8.507059e+37  ;;  %v1237_v12 = vsub.f32 1.0, %v1236_v31  ;;  %v1019_v35 = vsel %vm1016_vm8, %v1018_v49, %v1014_v48  ;;  %vm1242_vm13 = vmor %vm1240_vm12, %vm1241_vm10 }
 0xa25   :  { %v1004_v37 = vsel %vm1001_vm3, %v1003_v30, %v999_v22  ;;  %v1020_v2 = vmul.f32 %v2463_v10, %v1019_v35  ;;  %vm1245_vm5 = vcmp.eq.f32.partialorder %v1244_v5, 8.507059e+37  ;;  %vm1255_vm7 = vweird.f32 %v2511_v8  ;;  %v1735_v30 = vld [vmem:[%s2673_s3 + $0x30] sm:$0xff]  ;;  %v1740_v5 = vld [vmem:[%s2674_s4 + $0x38] sm:$0xff] }
 0xa26   :  { %v1361_v21 = vadd.f32 %v1913_v60, %v1360_v14  ;;  %v1005_v44 = vmul.f32 %v2455_v59, %v1004_v37  ;;  %v1238_v46 = vmul.f32 %v2517_v16, %v1237_v12  ;;  %v1247_v14 = vor.u32 1.1754944e-38, %v1246_v1 }
 0xa27   :  { %v1259_v20 = vand.u32 2147483647, %v2511_v8 }
 0xa28   :  { %v1365_v25 = vsel %vm1364_vm14, %v1913_v60, %v1361_v21  ;;  %v1834_v28 = vpop.permute.xlu1 %1833  ;;  %v1239_v53 = vadd.f32 %v2517_v16, %v1238_v46 }
 0xa29   :  { %v1835_v32 = vunpack.i.l.bf16 %v1834_v28  ;;  %v1370_v6 = vsel %vm1367_vm15, %v1369_v27, %v1365_v25  ;;  %v1836_v34 = vunpack.i.h.bf16 %v1834_v28  ;;  %v2536_v41 = vpop.eup %1916  ;;  %vm1260_vm10 = vcmp.eq.f32.partialorder %v1259_v20, 8.507059e+37 }
 0xa2a   :  { %v1356_v33 = vpop.xlane.xlu2 %1355  ;;  %v1371_v39 = vmul.f32 %v2469_v61, %v1370_v6  ;;  %v1251_v47 = vmul.f32 %v2536_v41, %v2511_v8  ;;  %v1243_v7 = vsel %vm1242_vm13, %v2517_v16, %v1239_v53  ;;  %vm1256_vm6 = vweird.f32 %v2536_v41  ;;  %v1734_v6 = vld [vmem:[%s2673_s3 + $0x28] sm:$0xff] }
 0xa2b   :  { %1918 = vrcp.f32 %v1356_v33  ;;  %v1829_v36 = vpop.permute.xlu0 %1828  ;;  %1413 = vmatpush.msrb.mxu2 %v1835_v32  ;;  %v1383_v60 = vand.u32 2147483648, %v1356_v33  ;;  %v1381_v54 = vand.u32 2147483647, %v1356_v33  ;;  %vm1377_vm14 = vweird.f32 %v1356_v33  ;;  %vm1257_vm8 = vmor %vm1255_vm7, %vm1256_vm6  ;;  %v1736_v32 = vld [vmem:[%s2673_s3 + $0x38] sm:$0xff] }
 0xa2c   :  { %v1830_v38 = vunpack.i.l.bf16 %v1829_v36  ;;  %v1831_v43 = vunpack.i.h.bf16 %v1829_v36  ;;  %v1252_v57 = vsub.f32 1.0, %v1251_v47  ;;  %v1248_v15 = vsel %vm1245_vm5, %v1247_v14, %v1243_v7  ;;  %1471 = vmatpush.msrb.mxu0 %v1736_v32 }
 0xa2d   :  { %1414 = vmatpush.msrb.mxu2 %v1836_v34  ;;  %v1384_v13 = vor.u32 1.1754944e-38, %v1383_v60  ;;  %vm1382_vm3 = vcmp.eq.f32.partialorder %v1381_v54, 8.507059e+37  ;;  %v1261_v16 = vand.u32 2147483648, %v2511_v8  ;;  %v1249_v19 = vmul.f32 %v2473_v17, %v1248_v15 }
 0xa2e   :  { %1047 = vmatpush.msrb.mxu1 %v1830_v38  ;;  %1773 = vmatmul.msk.f32.vlgmr.msrb.gmra.mxu2 %vm168_vm2, %v1371_v39  ;;  %v1253_v11 = vmul.f32 %v2536_v41, %v1252_v57  ;;  %v1539_v15 = vperm.slane %v2386_v63, 2 }
 0xa2f   :  { %1472 = vmatpush.msrb.mxu0 %v1735_v30 }
 0xa30   :  { %1048 = vmatpush.msrb.mxu1 %v1831_v43  ;;  %v1254_v24 = vadd.f32 %v2536_v41, %v1253_v11  ;;  %v1737_v11 = vld [vmem:[%s2674_s4 + $0x20] sm:$0xff] }
 0xa31   :  { %v1919_v61 = vpop.eup %1918  ;;  %1755 = vmatmul.msk.f32.vlgmr.msrb.gmra.mxu1 %vm168_vm2, %v1005_v44  ;;  %1473 = vmatpush.msrb.mxu0 %v1734_v6 }
 0xa32   :  { %v1373_v50 = vmul.f32 %v1919_v61, %v1356_v33  ;;  %v1839_v51 = vpop.permute.xlu2 %1838  ;;  %vm1378_vm11 = vweird.f32 %v1919_v61  ;;  %v1258_v21 = vsel %vm1257_vm8, %v2536_v41, %v1254_v24  ;;  %v1733_v33 = vld [vmem:[%s2673_s3 + $0x20] sm:$0xff]  ;;  %s1683_s3 = sshll.u32 %s2677_s7, 4  ;;  %s1684_s3 = int_to_ptr.hbm [resolvable:$true] %s1683_s3 }
 0xa33   :  { %v1840_v52 = vunpack.i.l.bf16 %v1839_v51  ;;  %v1841_v0 = vunpack.i.h.bf16 %v1839_v51  ;;  %vm1379_vm15 = vmor %vm1377_vm14, %vm1378_vm11  ;;  %1474 = vmatpush.msrb.mxu0 %v1733_v33 }
 0xa34   :  { %v1374_v59 = vsub.f32 1.0, %v1373_v50 }
 0xa35   :  { %1291 = vmatpush.msra.mxu1 %v1840_v52 }
 0xa36   :  { %v1375_v58 = vmul.f32 %v1919_v61, %v1374_v59 }
 0xa37   :  { %1292 = vmatpush.msra.mxu1 %v1841_v0 }
 0xa38   :  { %v1376_v56 = vadd.f32 %v1919_v61, %v1375_v58 }
 0xa39   :  { %1756 = vmatmul.msk.f32.gmra.mxu1 %vm168_vm2, %v1020_v2  ;;  %v1739_v2 = vld [vmem:[%s2674_s4 + $0x30] sm:$0xff] }
 0xa3a   :  { %v1380_v9 = vsel %vm1379_vm15, %v1919_v61, %v1376_v56  ;;  %v1452_v61 = vperm.slane %v2386_v63, 1  ;;  %1558 = vmatpush.msrb.mxu1 %v1740_v5  ;;  %v1738_v56 = vld [vmem:[%s2674_s4 + $0x28] sm:$0xff] }
 0xa3b   :  { %v1385_v18 = vsel %vm1382_vm3, %v1384_v13, %v1380_v9 }
 0xa3c   :  { %v1386_v10 = vmul.f32 %v2481_v26, %v1385_v18  ;;  %v1262_v26 = vor.u32 1.1754944e-38, %v1261_v16  ;;  %1559 = vmatpush.msrb.mxu1 %v1739_v2 }
 0xa3e   :  { %1774 = vmatmul.msk.f32.gmra.mxu2 %vm168_vm2, %v1386_v10  ;;  %v1263_v3 = vsel %vm1260_vm10, %v1262_v26, %v1258_v21  ;;  %1560 = vmatpush.msrb.mxu1 %v1738_v56 }
 0xa3f   :  { %v1264_v22 = vmul.f32 %v2477_v23, %v1263_v3 }
 0xa40   :  { %1561 = vmatpush.msrb.mxu1 %v1737_v11 }
 0xa41   :  { %1767 = vmatmul.msk.f32.vlgmr.msra.gmra.mxu1 %vm168_vm2, %v1249_v19 }
 0xa49   :  { %1768 = vmatmul.msk.f32.gmra.mxu1 %vm168_vm2, %v1264_v22 }
 0xa9f   :  { %v1172_v25 = vpop.f32.mrf.mxu2 }
 0xaa0   :  { %1424 = vrot.lane.b32.xlu0 %v1172_v25, %s2038_s10 }
 0xaa7   :  { %v1175_v27 = vpop.f32.mrf.mxu2 }
 0xaae   :  { %v1050_v28 = vpop.f32.mrf.mxu1 }
 0xab1   :  { %v1416_v17 = vpop.f32.mrf.mxu2 }
 0xab2   :  { %1440 = vrot.lane.b32.xlu0 %v1416_v17, %s2054_s1 }
 0xab6   :  { %v1053_v8 = vpop.f32.mrf.mxu1 }
 0xabe   :  { %v1294_v29 = vpop.f32.mrf.mxu1 }
 0xabf   :  { %1432 = vrot.lane.b32.xlu1 %v1294_v29, %s2053_s14 }
 0xac1   :  { %v1419_v23 = vpop.f32.mrf.mxu2 }
 0xac6   :  { %v1297_v31 = vpop.f32.mrf.mxu1 }
 0xac7   :  { %1426 = vrot.lane.b32.xlu1 %v1175_v27, %s2038_s10  ;;  %1434 = vrot.lane.b32.xlu0 %v1297_v31, %s2053_s14 }
 0xacf   :  { %1442 = vrot.lane.b32.xlu1 %v1419_v23, %s2054_s1 }
 0xb12   :  { %v1425_v34 = vpop.permute.xlu0 %1424 }
 0xb13   :  { %v1446_v36 = vsel %vm136_vm1, %v1050_v28, %v1425_v34 }
 0xb24   :  { %v1441_v38 = vpop.permute.xlu0 %1440 }
 0xb31   :  { %v1433_v37 = vpop.permute.xlu1 %1432 }
 0xb32   :  { %v1448_v12 = vsel %vm168_vm2, %v1446_v36, %v1433_v37  ;;  %v1748_v37 = vld [vmem:[%s2675_s5 + $0x78] sm:$0xff] }
 0xb33   :  { %v1450_v39 = vsel %vm646_vm9, %v1448_v12, %v1441_v38  ;;  %v1747_v38 = vld [vmem:[%s2675_s5 + $0x70] sm:$0xff]  ;;  %1605 = vmatpush.msrb.mxu3 %v1748_v37  ;;  %v1746_v12 = vld [vmem:[%s2675_s5 + $0x68] sm:$0xff] }
 0xb34   :  { %1775 = vmatmul.msk.f32.vlgmr.msrb.gmra.mxu0 %vm100_vm0, %v1450_v39  ;;  %v1745_v39 = vld [vmem:[%s2675_s5 + $0x60] sm:$0xff] }
 0xb35   :  { %1606 = vmatpush.msrb.mxu3 %v1747_v38 }
 0xb37   :  { %1607 = vmatpush.msrb.mxu3 %v1746_v12 }
 0xb39   :  { %v1427_v40 = vpop.permute.xlu1 %1426  ;;  %v1435_v42 = vpop.permute.xlu0 %1434  ;;  %1608 = vmatpush.msrb.mxu3 %v1745_v39 }
 0xb3a   :  { %v1447_v41 = vsel %vm136_vm1, %v1053_v8, %v1427_v40  ;;  %v1744_v40 = vld [vmem:[%s2675_s5 + $0x58] sm:$0xff] }
 0xb3b   :  { %v1449_v43 = vsel %vm168_vm2, %v1447_v41, %v1435_v42  ;;  %v1743_v41 = vld [vmem:[%s2675_s5 + $0x50] sm:$0xff]  ;;  %1609 = vmatpush.msrb.mxu3 %v1744_v40  ;;  %v1742_v42 = vld [vmem:[%s2675_s5 + $0x48] sm:$0xff] }
 0xb3d   :  { %1610 = vmatpush.msrb.mxu3 %v1743_v41 }
 0xb3f   :  { %1611 = vmatpush.msrb.mxu3 %v1742_v42 }
 0xb41   :  { %v1443_v44 = vpop.permute.xlu1 %1442 }
 0xb42   :  { %v1451_v45 = vsel %vm646_vm9, %v1449_v43, %v1443_v44  ;;  %v1741_v43 = vld [vmem:[%s2675_s5 + $0x40] sm:$0xff]  ;;  %s2056_s5 = smov [#allocation8]  }
 0xb43   :  { %1776 = vmatmul.msk.f32.gmra.mxu0 %vm100_vm0, %v1451_v45  ;;  %1612 = vmatpush.msrb.mxu3 %v1741_v43 }
 0xbb1   :  { %v1476_v46 = vpop.f32.mrf.mxu0 }
 0xbb2   :  { %v1477_v47 = vadd.f32 %v1476_v46, %v1452_v61 }
 0xbb4   :  { %v1482_v48 = vadd.f32 %v1477_v47, %v2378_v55 }
 0xbb6   :  { %v1484_v49 = vsel %vm100_vm0, %v1482_v48, 0.0 }
 0xbb7   :  { %1485 = vadd.xlane.f32.xlu2 %v1484_v49 }
 0xbc0   :  { %v1479_v50 = vpop.f32.mrf.mxu0 }
 0xbc1   :  { %v1480_v51 = vadd.f32 %v1479_v50, %v1452_v61 }
 0xbc3   :  { %v1483_v52 = vadd.f32 %v1480_v51, %v2382_v62 }
 0xbc5   :  { %v1487_v59 = vsel %vm100_vm0, %v1483_v52, 0.0 }
 0xbc6   :  { %1488 = vadd.xlane.f32.xlu0 %v1487_v59 }
 0xbda   :  { %1529 = vrot.lane.b32.xlu0 %v1452_v61, %s2045_s27 }
 0xc2a   :  { %v1486_v35 = vpop.xlane.xlu2 %1485 }
 0xc2b   :  { %v1490_v53 = vmul.f32 %v1486_v35, %v2305_v4 }
 0xc2d   :  { %v1492_v57 = vsub.f32 %v1482_v48, %v1490_v53 }
 0xc2f   :  { %v1494_v60 = vmul.f32 %v1492_v57, %v1492_v57 }
 0xc31   :  { %v1496_v0 = vsel %vm100_vm0, %v1494_v60, 0.0 }
 0xc32   :  { %1497 = vadd.xlane.f32.xlu1 %v1496_v0 }
 0xc39   :  { %v1489_v55 = vpop.xlane.xlu0 %1488 }
 0xc3a   :  { %v1491_v1 = vmul.f32 %v1489_v55, %v2305_v4 }
 0xc3c   :  { %v1493_v58 = vsub.f32 %v1483_v52, %v1491_v1 }
 0xc3e   :  { %v1495_v54 = vmul.f32 %v1493_v58, %v1493_v58 }
 0xc40   :  { %v1499_v62 = vsel %vm100_vm0, %v1495_v54, 0.0 }
 0xc41   :  { %1500 = vadd.xlane.f32.xlu2 %v1499_v62 }
 0xc4b   :  { %1588 = vrot.lane.b32.xlu1 %v1539_v15, %s2041_s16 }
 0xc4c   :  { %v1530_v22 = vpop.permute.xlu0 %1529 }
 0xc59   :  { %1534 = vrot.lane.b32.xlu2 %v1452_v61, %s2041_s16 }
 0xca5   :  { %v1498_v7 = vpop.xlane.xlu1 %1497 }
 0xca6   :  { %v1502_v13 = vmul.f32 %v1498_v7, %v2305_v4 }
 0xca8   :  { %v1504_v14 = vadd.f32 1e-12, %v1502_v13 }
 0xcaa   :  { %1920 = vrsqrt.f32 %v1504_v14  ;;  %vm1512_vm2 = vweird.f32 %v1504_v14 }
 0xcb0   :  { %v1921_v9 = vpop.eup %1920 }
 0xcb1   :  { %v1507_v18 = vmul.f32 %v1921_v9, %v1504_v14  ;;  %vm1513_vm1 = vweird.f32 %v1921_v9 }
 0xcb2   :  { %vm1514_vm9 = vmor %vm1512_vm2, %vm1513_vm1 }
 0xcb3   :  { %v1508_v10 = vmul.f32 %v1921_v9, %v1507_v18 }
 0xcb4   :  { %v1501_v24 = vpop.xlane.xlu2 %1500 }
 0xcb5   :  { %v1509_v16 = vmul.f32 0.5, %v1508_v10  ;;  %v1503_v19 = vmul.f32 %v1501_v24, %v2305_v4 }
 0xcb7   :  { %v1510_v20 = vsub.f32 1.5, %v1509_v16  ;;  %v1505_v21 = vadd.f32 1e-12, %v1503_v19 }
 0xcb9   :  { %1922 = vrsqrt.f32 %v1505_v21  ;;  %v1511_v26 = vmul.f32 %v1921_v9, %v1510_v20  ;;  %vm1522_vm12 = vweird.f32 %v1505_v21 }
 0xcbb   :  { %v1515_v3 = vsel %vm1514_vm9, %v1921_v9, %v1511_v26 }
 0xcbc   :  { %v1526_v25 = vmul.f32 %v1515_v3, %v1492_v57  ;;  %v1535_v27 = vpop.permute.xlu2 %1534 }
 0xcbd   :  { %v1589_v2 = vpop.permute.xlu1 %1588 }
 0xcbe   :  { %v1532_v28 = vmul.f32 %v1530_v22, %v1526_v25 }
 0xcbf   :  { %v1923_v17 = vpop.eup %1922 }
 0xcc0   :  { %v1517_v8 = vmul.f32 %v1923_v17, %v1505_v21  ;;  %v1537_v29 = vadd.f32 %v1535_v27, %v1532_v28  ;;  %vm1523_vm11 = vweird.f32 %v1923_v17 }
 0xcc1   :  { %vm1524_vm13 = vmor %vm1522_vm12, %vm1523_vm11 }
 0xcc2   :  { %v1518_v31 = vmul.f32 %v1923_v17, %v1517_v8  ;;  %1777 = vmatmul.msk.f32.vlgmr.msrb.gmra.mxu1 %vm100_vm0, %v1537_v29 }
 0xcc4   :  { %v1519_v23 = vmul.f32 0.5, %v1518_v31 }
 0xcc6   :  { %v1520_v32 = vsub.f32 1.5, %v1519_v23 }
 0xcc8   :  { %v1521_v30 = vmul.f32 %v1923_v17, %v1520_v32 }
 0xcca   :  { %v1525_v6 = vsel %vm1524_vm13, %v1923_v17, %v1521_v30 }
 0xccb   :  { %v1527_v33 = vmul.f32 %v1525_v6, %v1493_v58 }
 0xccd   :  { %v1533_v34 = vmul.f32 %v1530_v22, %v1527_v33 }
 0xccf   :  { %v1538_v36 = vadd.f32 %v1535_v27, %v1533_v34  ;;  %v1666_v27 = vperm.slane %v2386_v63, 3 }
 0xcd1   :  { %1778 = vmatmul.msk.f32.gmra.mxu1 %vm100_vm0, %v1538_v36 }
 0xd3f   :  { %v1563_v44 = vpop.f32.mrf.mxu1 }
 0xd40   :  { %v1564_v45 = vadd.f32 %v1563_v44, %v1539_v15 }
 0xd42   :  { %v1571_v61 = vmul.f32 0.044715, %v1564_v45  ;;  %v1569_v35 = vmul.f32 0.5, %v1564_v45 }
 0xd44   :  { %v1573_v46 = vmul.f32 %v1571_v61, %v1564_v45 }
 0xd46   :  { %v1575_v47 = vmul.f32 %v1573_v46, %v1564_v45 }
 0xd48   :  { %v1577_v48 = vadd.f32 %v1575_v47, %v1564_v45 }
 0xd4a   :  { %v1579_v49 = vmul.f32 0.7978846, %v1577_v48 }
 0xd4c   :  { %1924 = vtanh.f32 %v1579_v49 }
 0xd4e   :  { %v1566_v50 = vpop.f32.mrf.mxu1 }
 0xd4f   :  { %v1567_v51 = vadd.f32 %v1566_v50, %v1539_v15 }
 0xd51   :  { %v1572_v52 = vmul.f32 0.044715, %v1567_v51  ;;  %v1570_v54 = vmul.f32 0.5, %v1567_v51 }
 0xd52   :  { %v1925_v59 = vpop.eup %1924 }
 0xd53   :  { %v1583_v53 = vadd.f32 1.0, %v1925_v59  ;;  %v1574_v57 = vmul.f32 %v1572_v52, %v1567_v51 }
 0xd55   :  { %v1585_v60 = vmul.f32 %v1583_v53, %v1569_v35  ;;  %v1576_v0 = vmul.f32 %v1574_v57, %v1567_v51 }
 0xd57   :  { %1779 = vmatmul.msk.f32.vlgmr.msrb.gmra.mxu3 %vm795_vm4, %v1585_v60  ;;  %v1578_v55 = vadd.f32 %v1576_v0, %v1567_v51 }
 0xd59   :  { %v1580_v1 = vmul.f32 0.7978846, %v1578_v55 }
 0xd5b   :  { %1926 = vtanh.f32 %v1580_v1 }
 0xd61   :  { %v1927_v58 = vpop.eup %1926 }
 0xd62   :  { %v1584_v62 = vadd.f32 1.0, %v1927_v58 }
 0xd64   :  { %v1586_v5 = vmul.f32 %v1584_v62, %v1570_v54 }
 0xd66   :  { %1780 = vmatmul.msk.f32.gmra.mxu3 %vm795_vm4, %v1586_v5 }
 0xdda   :  { %v1614_v56 = vpop.f32.mrf.mxu3 }
 0xddb   :  { %v1615_v7 = vadd.f32 %v1614_v56, %v1589_v2 }
 0xddd   :  { %v1620_v11 = vadd.f32 %v1615_v7, %v1537_v29 }
 0xddf   :  { %v1622_v13 = vsel %vm100_vm0, %v1620_v11, 0.0 }
 0xde0   :  { %1623 = vadd.xlane.f32.xlu0 %v1622_v13 }
 0xde9   :  { %v1617_v14 = vpop.f32.mrf.mxu3 }
 0xdea   :  { %v1618_v9 = vadd.f32 %v1617_v14, %v1589_v2 }
 0xdec   :  { %v1621_v18 = vadd.f32 %v1618_v9, %v1538_v36 }
 0xdee   :  { %v1625_v15 = vsel %vm100_vm0, %v1621_v18, 0.0 }
 0xdef   :  { %1626 = vadd.xlane.f32.xlu2 %v1625_v15 }
 0xe53   :  { %v1624_v10 = vpop.xlane.xlu0 %1623 }
 0xe54   :  { %v1628_v24 = vmul.f32 %v1624_v10, %v2305_v4 }
 0xe56   :  { %v1630_v16 = vsub.f32 %v1620_v11, %v1628_v24 }
 0xe58   :  { %v1632_v19 = vmul.f32 %v1630_v16, %v1630_v16 }
 0xe5a   :  { %v1634_v20 = vsel %vm100_vm0, %v1632_v19, 0.0 }
 0xe5b   :  { %1635 = vadd.xlane.f32.xlu1 %v1634_v20 }
 0xe62   :  { %v1627_v21 = vpop.xlane.xlu2 %1626 }
 0xe63   :  { %v1629_v26 = vmul.f32 %v1627_v21, %v2305_v4 }
 0xe65   :  { %v1631_v3 = vsub.f32 %v1621_v18, %v1629_v26 }
 0xe67   :  { %v1633_v22 = vmul.f32 %v1631_v3, %v1631_v3 }
 0xe69   :  { %v1637_v25 = vsel %vm100_vm0, %v1633_v22, 0.0 }
 0xe6a   :  { %1638 = vadd.xlane.f32.xlu0 %v1637_v25 }
 0xe7e   :  { %1670 = vrot.lane.b32.xlu0 %v1666_v27, %s2045_s27  ;;  %s1681_s27 = sshll.u32 %s2056_s5, 4  ;;  %s1682_s27 = int_to_ptr.vmem [resolvable:$true] %s1681_s27 }
 0xece   :  { %v1636_v28 = vpop.xlane.xlu1 %1635 }
 0xecf   :  { %v1640_v17 = vmul.f32 %v1636_v28, %v2305_v4 }
 0xed1   :  { %v1642_v8 = vadd.f32 1e-12, %v1640_v17 }
 0xed3   :  { %1928 = vrsqrt.f32 %v1642_v8  ;;  %vm1650_vm14 = vweird.f32 %v1642_v8 }
 0xed9   :  { %v1929_v29 = vpop.eup %1928 }
 0xeda   :  { %v1645_v31 = vmul.f32 %v1929_v29, %v1642_v8  ;;  %vm1651_vm4 = vweird.f32 %v1929_v29 }
 0xedb   :  { %vm1652_vm15 = vmor %vm1650_vm14, %vm1651_vm4 }
 0xedc   :  { %v1646_v23 = vmul.f32 %v1929_v29, %v1645_v31 }
 0xedd   :  { %v1639_v32 = vpop.xlane.xlu0 %1638 }
 0xede   :  { %v1647_v30 = vmul.f32 0.5, %v1646_v23  ;;  %v1641_v6 = vmul.f32 %v1639_v32, %v2305_v4 }
 0xee0   :  { %v1648_v33 = vsub.f32 1.5, %v1647_v30  ;;  %v1643_v34 = vadd.f32 1e-12, %v1641_v6 }
 0xee2   :  { %1930 = vrsqrt.f32 %v1643_v34  ;;  %v1649_v36 = vmul.f32 %v1929_v29, %v1648_v33  ;;  %vm1660_vm5 = vweird.f32 %v1643_v34 }
 0xee4   :  { %v1653_v37 = vsel %vm1652_vm15, %v1929_v29, %v1649_v36 }
 0xee5   :  { %v1664_v39 = vmul.f32 %v1653_v37, %v1630_v16 }
 0xee7   :  { %v1667_v42 = vmul.f32 %v1666_v27, %v1664_v39 }
 0xee8   :  { %v1931_v63 = vpop.eup %1930 }
 0xee9   :  { %v1655_v38 = vmul.f32 %v1931_v63, %v1643_v34  ;;  %vm1661_vm3 = vweird.f32 %v1931_v63 }
 0xeea   :  { %vm1662_vm6 = vmor %vm1660_vm5, %vm1661_vm3 }
 0xeeb   :  { %v1656_v12 = vmul.f32 %v1931_v63, %v1655_v38 }
 0xeed   :  { %v1657_v40 = vmul.f32 0.5, %v1656_v12 }
 0xeef   :  { %v1658_v41 = vsub.f32 1.5, %v1657_v40 }
 0xef0   :  { %v1671_v43 = vpop.permute.xlu0 %1670 }
 0xef1   :  { %v1659_v44 = vmul.f32 %v1931_v63, %v1658_v41  ;;  %v1673_v4 = vadd.f32 %v1671_v43, %v1667_v42 }
 0xef3   :  { %v1663_v45 = vsel %vm1662_vm6, %v1931_v63, %v1659_v44  ;;  %1675 = vst.msk [vmem:[#allocation8] sm:$0xff] %vm100_vm0, %v1673_v4 }
 0xef4   :  { %v1665_v61 = vmul.f32 %v1663_v45, %v1631_v3 }
 0xef6   :  { %v1668_v46 = vmul.f32 %v1666_v27, %v1665_v61 }
 0xef8   :  { %v1674_v47 = vadd.f32 %v1671_v43, %v1668_v46 }
 0xefa   :  { %1676 = vst.msk [vmem:[#allocation8 + $0x8] sm:$0xff] %vm100_vm0, %v1674_v47 }
 0xefb   :  { %1689 = dma.vmem_to_hbm [thread:$0]  %s1682_s27, 256, %s1684_s3, [#allocation4], %s2037_s9, %s2037_s9, %s2038_s10  }
 0xefc   :  { %2034 = dma.done.wait [#allocation4], 256  }
 0xefd   :  { %2035 = vsyncadd [#allocation4], 4294967040 }
 0xefe   :  { %1694 = vsyncpa [#allocation3], 1 }
 0xeff   :  { %1695 = vsyncpa [#allocation6], 1 }
 0xf00   :  { %1696 = vsyncpa [#allocation4], 1 }

</bundles_post_ra>
